<compile_context>
chip_gen: v7x
topology: tpu7x:2x2x1
jax: 0.10.0
libtpu: 0.0.40
codegen_flags: <defaults>
</compile_context>

<pallas_src>
import jax
import jax.numpy as jnp
from jax.experimental import pallas as pl
from jax.experimental.pallas import tpu as pltpu

# ----------------------- small synthetic BERT-like config -----------------------
B = 2          # batch
S = 8          # seq_len
H = 32         # hidden_size
NH = 4         # num_attention_heads
DH = H // NH   # per-head dim
FF = 64        # intermediate_size
L = 2          # num_hidden_layers
NL = 3         # num_labels
VOCAB = 128    # vocab size (synthetic)
MAXP = 32      # max position embeddings
EPS = 1e-12    # BERT LayerNorm eps

# Lane-tile-aligned fused QKV layout: Q @ [0:H], K @ [128:128+H], V @ [256:256+H].
QKV_W = 3 * 128
K_OFF = 128
V_OFF = 256

# Packed f32 vector-parameter layout (one (PV_ROWS, QKV_W) array, static row offsets).
PV_EMB_G = 0
PV_EMB_B = 1
PV_LAYER0 = 2
PL_BQKV, PL_BO, PL_LN1G, PL_LN1B, PL_B1, PL_B2, PL_LN2G, PL_LN2B = range(8)
PV_PER_LAYER = 8
PV_BP = PV_LAYER0 + PV_PER_LAYER * L
PV_BFC = PV_BP + 1
PV_ROWS = PV_BFC + 1


# ----------------------------- in-kernel helpers --------------------------------
def _layer_norm(x, g, b):
    # One-pass mean / second moment (two independent lane reductions); clamp var >= 0.
    # (Slightly less robust than two-pass; fine at this activation scale.)
    mu = jnp.mean(x, axis=-1, keepdims=True)
    ex2 = jnp.mean(x * x, axis=-1, keepdims=True)
    var = jnp.maximum(ex2 - mu * mu, 0.0)
    return (x - mu) * jax.lax.rsqrt(var + EPS) * g + b


def _softmax(x):
    m = jnp.max(x, axis=-1, keepdims=True)
    e = jnp.exp(x - m)
    s = jnp.sum(e, axis=-1, keepdims=True)
    return e * pl.reciprocal(s, approx=True)   # divide goes to the EUP slot


def _gelu(x):
    # TODO(synk): HF BERT uses exact erf-based GELU; tanh approximation used here
    # since lax.erf lowering is not guaranteed in Mosaic.
    c = 0.7978845608028654  # sqrt(2/pi)
    return 0.5 * x * (1.0 + jnp.tanh(c * (x + 0.044715 * x * x * x)))


# ----------------------------------- kernel -------------------------------------
def make_kernel(Bb):
    """Bb = per-invocation batch (B when grid-free, 1 with the v7x batch grid)."""

    def kernel(x_emb_ref, mask_bias_ref, head_mask_ref,
               wqkv_ref, wo_ref, w1_ref, w2_ref, wp_ref, wfc_ref,
               pvec_ref, out_ref):
        # Embedding LayerNorm (flatten batch & seq; hidden stays on lanes).
        x = x_emb_ref[...].reshape(Bb * S, H)
        emb_g = pvec_ref[PV_EMB_G:PV_EMB_G + 1, 0:H]
        emb_b = pvec_ref[PV_EMB_B:PV_EMB_B + 1, 0:H]
        x = _layer_norm(x, emb_g, emb_b)

        # Hoisted (loop-invariant) broadcasts.
        hm = head_mask_ref[...]                              # (1, NH, 1, H) 0/1 lane masks
        mask_bias = mask_bias_ref[...]                       # (Bb, 1, S) additive key bias
        mask_bh = jnp.broadcast_to(
            mask_bias[:, None, :, :], (Bb, NH, 1, S)).reshape(Bb * NH, 1, S)

        for l in range(L):                                   # static layer loop
            base = PV_LAYER0 + l * PV_PER_LAYER

            # Fused QKV projection: one wide matmul; Q/K/V land on 128-lane tile
            # boundaries so the slices below are tile-aligned (no lane shuffles).
            bqkv = pvec_ref[base + PL_BQKV:base + PL_BQKV + 1, :]          # (1, 384)
            qkv = jnp.dot(x.astype(jnp.bfloat16), wqkv_ref[l],
                          preferred_element_type=jnp.float32) + bqkv       # (Bb*S, 384)
            q3 = qkv[:, 0:H].reshape(Bb, S, H)        # 1/sqrt(DH) folded into W_q, b_q
            k3 = qkv[:, K_OFF:K_OFF + H].reshape(Bb, S, H)
            v3 = qkv[:, V_OFF:V_OFF + H].reshape(Bb, S, H)

            # Batched multi-head attention: stack lane-masked Q/V per head along a
            # leading (Bb*NH) batch dim; ONE score einsum + ONE softmax + ONE context
            # einsum per layer.  Head assembly = sum over the untiled NH axis (the
            # masked V keeps only head-h output lanes).
            qm = (q3[:, None, :, :] * hm).reshape(Bb * NH, S, H).astype(jnp.bfloat16)
            vm = (v3[:, None, :, :] * hm).reshape(Bb * NH, S, H).astype(jnp.bfloat16)
            kt = jnp.broadcast_to(k3.astype(jnp.bfloat16)[:, None, :, :],
                                  (Bb, NH, S, H)).reshape(Bb * NH, S, H)

            s = jnp.einsum('bqd,bkd->bqk', qm, kt,
                           preferred_element_type=jnp.float32)             # (Bb*NH, S, S)
            p = _softmax(s + mask_bh)
            ctx_h = jnp.einsum('bqk,bkd->bqd', p.astype(jnp.bfloat16), vm,
                               preferred_element_type=jnp.float32)         # (Bb*NH, S, H)
            ctx = jnp.sum(ctx_h.reshape(Bb, NH, S, H), axis=1)             # (Bb, S, H)

            bo = pvec_ref[base + PL_BO:base + PL_BO + 1, 0:H]
            attn_out = jnp.dot(ctx.reshape(Bb * S, H).astype(jnp.bfloat16), wo_ref[l],
                               preferred_element_type=jnp.float32) + bo
            ln1_g = pvec_ref[base + PL_LN1G:base + PL_LN1G + 1, 0:H]
            ln1_b = pvec_ref[base + PL_LN1B:base + PL_LN1B + 1, 0:H]
            x = _layer_norm(x + attn_out, ln1_g, ln1_b)

            b1 = pvec_ref[base + PL_B1:base + PL_B1 + 1, 0:FF]
            h1 = _gelu(jnp.dot(x.astype(jnp.bfloat16), w1_ref[l],
                               preferred_element_type=jnp.float32) + b1)
            b2 = pvec_ref[base + PL_B2:base + PL_B2 + 1, 0:H]
            ffn = jnp.dot(h1.astype(jnp.bfloat16), w2_ref[l],
                          preferred_element_type=jnp.float32) + b2
            ln2_g = pvec_ref[base + PL_LN2G:base + PL_LN2G + 1, 0:H]
            ln2_b = pvec_ref[base + PL_LN2B:base + PL_LN2B + 1, 0:H]
            x = _layer_norm(x + ffn, ln2_g, ln2_b)

        # BERT pooler: dense + tanh on the [CLS] (first) token of each sequence.
        cls = x.reshape(Bb, S, H)[:, 0, :]                                  # (Bb, H)
        bp = pvec_ref[PV_BP:PV_BP + 1, 0:H]
        pooled = jnp.tanh(jnp.dot(cls.astype(jnp.bfloat16), wp_ref[...],
                                  preferred_element_type=jnp.float32) + bp)

        # Classification head: self.fc = nn.Linear(hidden_size, num_labels)
        bfc = pvec_ref[PV_BFC:PV_BFC + 1, 0:NL]
        logits = jnp.dot(pooled.astype(jnp.bfloat16), wfc_ref[...],
                         preferred_element_type=jnp.float32) + bfc          # (Bb, NL)
        out_ref[...] = logits.reshape(Bb, 1, NL)

    return kernel


# ----------------------------- parameters (synthetic) ----------------------------
def make_params(key):
    # NOTE: weights are stored/multiplied in bf16 (f32 accumulation) — an accepted
    # precision tradeoff vs. the f32 PyTorch reference.
    def dense(k, shape):
        return (0.02 * jax.random.normal(k, shape)).astype(jnp.float32)

    ks = jax.random.split(key, 12)
    scale = 1.0 / (DH ** 0.5)

    # Fused, lane-tile-aligned QKV weight: (L, H, 3*128), zero-padded between heads'
    # projections so in-kernel slices start at 128-lane tile boundaries.
    wq = dense(ks[3], (L, H, H)) * scale           # fold 1/sqrt(DH) into W_q ...
    wk = dense(ks[4], (L, H, H))
    wv = dense(ks[5], (L, H, H))
    wqkv = jnp.zeros((L, H, QKV_W), jnp.float32)
    wqkv = wqkv.at[:, :, 0:H].set(wq)
    wqkv = wqkv.at[:, :, K_OFF:K_OFF + H].set(wk)
    wqkv = wqkv.at[:, :, V_OFF:V_OFF + H].set(wv)
    wqkv = wqkv.astype(jnp.bfloat16)

    # Biases / LN params (BERT has them; zeros/ones in this synthetic setup).
    bq = jnp.zeros((L, H), jnp.float32) * scale    # ... and fold it into b_q as well
    bk = jnp.zeros((L, H), jnp.float32)
    bv = jnp.zeros((L, H), jnp.float32)
    bo = jnp.zeros((L, H), jnp.float32)
    b1 = jnp.zeros((L, FF), jnp.float32)
    b2 = jnp.zeros((L, H), jnp.float32)
    ln1_g = jnp.ones((L, H), jnp.float32); ln1_b = jnp.zeros((L, H), jnp.float32)
    ln2_g = jnp.ones((L, H), jnp.float32); ln2_b = jnp.zeros((L, H), jnp.float32)
    emb_g = jnp.ones((H,), jnp.float32);   emb_b = jnp.zeros((H,), jnp.float32)
    bp = jnp.zeros((H,), jnp.float32);     bfc = jnp.zeros((NL,), jnp.float32)

    # Pack all tiny f32 vectors into ONE (PV_ROWS, 384) array -> one DMA instead of 15.
    def pad_row(v):
        v = v.reshape(-1).astype(jnp.float32)
        return jnp.pad(v, (0, QKV_W - v.shape[0]))

    rows = [pad_row(emb_g), pad_row(emb_b)]
    for l in range(L):
        bqkv_row = jnp.zeros((QKV_W,), jnp.float32)
        bqkv_row = bqkv_row.at[0:H].set(bq[l])
        bqkv_row = bqkv_row.at[K_OFF:K_OFF + H].set(bk[l])
        bqkv_row = bqkv_row.at[V_OFF:V_OFF + H].set(bv[l])
        rows += [bqkv_row, pad_row(bo[l]), pad_row(ln1_g[l]), pad_row(ln1_b[l]),
                 pad_row(b1[l]), pad_row(b2[l]), pad_row(ln2_g[l]), pad_row(ln2_b[l])]
    rows += [pad_row(bp), pad_row(bfc)]
    pvec = jnp.stack(rows, axis=0)
    assert pvec.shape == (PV_ROWS, QKV_W), pvec.shape

    return dict(
        word_emb=dense(ks[0], (VOCAB, H)),
        pos_emb=dense(ks[1], (MAXP, H)),
        type_emb=dense(ks[2], (2, H)),
        wqkv=wqkv,
        wo=dense(ks[6], (L, H, H)).astype(jnp.bfloat16),
        w1=dense(ks[7], (L, H, FF)).astype(jnp.bfloat16),
        w2=dense(ks[8], (L, FF, H)).astype(jnp.bfloat16),
        wp=dense(ks[9], (H, H)).astype(jnp.bfloat16),
        wfc=dense(ks[10], (H, NL)).astype(jnp.bfloat16),
        pvec=pvec,
    )


# ----------------------------------- wrapper -------------------------------------
def _detect_v7x():
    # Parallel batch grid only pays off on v7x (2 TensorCores/chip); on single-TC
    # v5e/v6e a grid is a serial loop that only adds per-step overhead.
    try:
        kind = jax.devices()[0].device_kind.lower()
    except Exception:
        return False
    return "v7" in kind


_USE_BATCH_GRID = _detect_v7x()


@jax.jit
def financial_risk_classifier(input_ids, attention_mask, params):
    # TODO(synk): embedding gather stays as plain-JAX glue (16 KB table); XLA fuses
    # the gather + adds so x_emb feeds the kernel without extra op boundaries.
    x_emb = (params["word_emb"][input_ids]
             + params["pos_emb"][None, :S, :]
             + params["type_emb"][0][None, None, :]).astype(jnp.float32)

    # Additive attention bias over the key axis, shaped (B, 1, S).
    mask_bias = ((1.0 - attention_mask.astype(jnp.float32)) * (-1e9)).reshape(B, 1, S)

    # Per-head 0/1 lane masks, shaped (1, NH, 1, H) for broadcast inside the kernel.
    head_mask = (jnp.arange(H) // DH == jnp.arange(NH)[:, None]).astype(jnp.float32)
    head_mask = head_mask.reshape(1, NH, 1, H)

    args = (x_emb, mask_bias, head_mask,
            params["wqkv"], params["wo"], params["w1"], params["w2"],
            params["wp"], params["wfc"], params["pvec"])
    out_shape = jax.ShapeDtypeStruct((B, 1, NL), jnp.float32)

    if _USE_BATCH_GRID:
        # v7x only: one sequence per TensorCore via a parallel batch grid; weights and
        # packed vectors keep constant block indices so they stay VMEM-resident.
        def batch_block(shape):
            n = len(shape) - 1
            return pl.BlockSpec((1,) + tuple(shape[1:]),
                                lambda b, _n=n: (b,) + (0,) * _n)

        def resident(shape):
            n = len(shape)
            return pl.BlockSpec(tuple(shape), lambda b, _n=n: (0,) * _n)

        in_specs = [
            batch_block(x_emb.shape),
            batch_block(mask_bias.shape),
            resident(head_mask.shape),
            resident(params["wqkv"].shape),
            resident(params["wo"].shape),
            resident(params["w1"].shape),
            resident(params["w2"].shape),
            resident(params["wp"].shape),
            resident(params["wfc"].shape),
            resident(params["pvec"].shape),
        ]
        out = pl.pallas_call(
            make_kernel(1),
            out_shape=out_shape,
            grid=(B,),
            in_specs=in_specs,
            out_specs=pl.BlockSpec((1, 1, NL), lambda b: (b, 0, 0)),
            compiler_params=pltpu.CompilerParams(dimension_semantics=("parallel",)),
        )(*args)
    else:
        # v5e / v6e: grid-free, everything resident in VMEM (model ~100 KB).
        vmem = pl.BlockSpec(memory_space=pltpu.MemorySpace.VMEM)
        out = pl.pallas_call(
            make_kernel(B),
            out_shape=out_shape,
            in_specs=[vmem] * len(args),
            out_specs=vmem,
        )(*args)

    return out[:, 0, :]


if __name__ == "__main__":
    key = jax.random.PRNGKey(0)
    k_ids, _ = jax.random.split(key)
    input_ids = jax.random.randint(k_ids, (B, S), 0, VOCAB, dtype=jnp.int32)
    attention_mask = jnp.array(
        [[1, 1, 1, 1, 1, 1, 1, 1],
         [1, 1, 1, 1, 1, 1, 0, 0]], dtype=jnp.int32)

    params = make_params(jax.random.PRNGKey(42))

    logits = financial_risk_classifier(input_ids, attention_mask, params)
    jax.block_until_ready(logits)

    assert logits.shape == (B, NL), logits.shape
    assert bool(jnp.all(jnp.isfinite(logits)))
    print("KERNEL_OK")
</pallas_src>

<mosaic_0001>
module attributes {stable_mosaic.version = 11 : i64} {
  func.func @kernel(%arg0: memref<2x8x32xf32, #tpu.memory_space<vmem>>, %arg1: memref<2x1x8xf32, #tpu.memory_space<vmem>>, %arg2: memref<1x4x1x32xf32, #tpu.memory_space<vmem>>, %arg3: memref<2x32x384xbf16, #tpu.memory_space<vmem>>, %arg4: memref<2x32x32xbf16, #tpu.memory_space<vmem>>, %arg5: memref<2x32x64xbf16, #tpu.memory_space<vmem>>, %arg6: memref<2x64x32xbf16, #tpu.memory_space<vmem>>, %arg7: memref<32x32xbf16, #tpu.memory_space<vmem>>, %arg8: memref<32x3xbf16, #tpu.memory_space<vmem>>, %arg9: memref<20x384xf32, #tpu.memory_space<vmem>>, %arg10: memref<2x1x3xf32, #tpu.memory_space<vmem>>) attributes {dimension_semantics = [], scalar_prefetch = 0 : i64, scratch_operands = 0 : i64, tpu.core_type = #tpu.core_type<tc>} {
    %c0 = arith.constant 0 : index
    %c0_0 = arith.constant 0 : index
    %c0_1 = arith.constant 0 : index
    %0 = vector.load %arg0[%c0, %c0_0, %c0_1] : memref<2x8x32xf32, #tpu.memory_space<vmem>>, vector<2x8x32xf32>
    %1 = vector.shape_cast %0 : vector<2x8x32xf32> to vector<16x32xf32>
    %c0_2 = arith.constant 0 : index
    %c0_3 = arith.constant 0 : index
    %2 = vector.load %arg9[%c0_2, %c0_3] : memref<20x384xf32, #tpu.memory_space<vmem>>, vector<1x32xf32>
    %c1 = arith.constant 1 : index
    %c0_4 = arith.constant 0 : index
    %3 = vector.load %arg9[%c1, %c0_4] : memref<20x384xf32, #tpu.memory_space<vmem>>, vector<1x32xf32>
    %cst = arith.constant dense<0.000000e+00> : vector<16xf32>
    %4 = vector.multi_reduction <add>, %1, %cst [1] : vector<16x32xf32> to vector<16xf32>
    %5 = vector.shape_cast %4 : vector<16xf32> to vector<16x1xf32>
    %cst_5 = arith.constant 3.200000e+01 : f32
    %6 = vector.broadcast %cst_5 : f32 to vector<16x1xf32>
    %7 = arith.divf %5, %6 : vector<16x1xf32>
    %8 = arith.mulf %1, %1 : vector<16x32xf32>
    %cst_6 = arith.constant dense<0.000000e+00> : vector<16xf32>
    %9 = vector.multi_reduction <add>, %8, %cst_6 [1] : vector<16x32xf32> to vector<16xf32>
    %10 = vector.shape_cast %9 : vector<16xf32> to vector<16x1xf32>
    %cst_7 = arith.constant 3.200000e+01 : f32
    %11 = vector.broadcast %cst_7 : f32 to vector<16x1xf32>
    %12 = arith.divf %10, %11 : vector<16x1xf32>
    %13 = arith.mulf %7, %7 : vector<16x1xf32>
    %14 = arith.subf %12, %13 : vector<16x1xf32>
    %cst_8 = arith.constant 0.000000e+00 : f32
    %15 = vector.broadcast %cst_8 : f32 to vector<16x1xf32>
    %16 = arith.maximumf %14, %15 : vector<16x1xf32>
    %17 = vector.broadcast %7 : vector<16x1xf32> to vector<16x32xf32>
    %18 = arith.subf %1, %17 : vector<16x32xf32>
    %cst_9 = arith.constant 9.99999996E-13 : f32
    %19 = vector.broadcast %cst_9 : f32 to vector<16x1xf32>
    %20 = arith.addf %16, %19 : vector<16x1xf32>
    %21 = math.rsqrt %20 : vector<16x1xf32>
    %22 = vector.broadcast %21 : vector<16x1xf32> to vector<16x32xf32>
    %23 = arith.mulf %18, %22 : vector<16x32xf32>
    %24 = vector.broadcast %2 : vector<1x32xf32> to vector<16x32xf32>
    %25 = arith.mulf %23, %24 : vector<16x32xf32>
    %26 = vector.broadcast %3 : vector<1x32xf32> to vector<16x32xf32>
    %27 = arith.addf %25, %26 : vector<16x32xf32>
    %c0_10 = arith.constant 0 : index
    %c0_11 = arith.constant 0 : index
    %c0_12 = arith.constant 0 : index
    %c0_13 = arith.constant 0 : index
    %28 = vector.load %arg2[%c0_10, %c0_11, %c0_12, %c0_13] : memref<1x4x1x32xf32, #tpu.memory_space<vmem>>, vector<1x4x1x32xf32>
    %c0_14 = arith.constant 0 : index
    %c0_15 = arith.constant 0 : index
    %c0_16 = arith.constant 0 : index
    %29 = vector.load %arg1[%c0_14, %c0_15, %c0_16] : memref<2x1x8xf32, #tpu.memory_space<vmem>>, vector<2x1x8xf32>
    %30 = vector.shape_cast %29 : vector<2x1x8xf32> to vector<2x1x1x8xf32>
    %31 = vector.shape_cast %30 : vector<2x1x1x8xf32> to vector<2x1x1x8xf32>
    %32 = vector.broadcast %31 : vector<2x1x1x8xf32> to vector<2x4x1x8xf32>
    %33 = vector.shape_cast %32 : vector<2x4x1x8xf32> to vector<8x1x8xf32>
    %c2 = arith.constant 2 : index
    %c0_17 = arith.constant 0 : index
    %34 = vector.load %arg9[%c2, %c0_17] : memref<20x384xf32, #tpu.memory_space<vmem>>, vector<1x384xf32>
    %35 = arith.truncf %27 : vector<16x32xf32> to vector<16x32xbf16>
    %c0_18 = arith.constant 0 : index
    %c0_19 = arith.constant 0 : index
    %c0_20 = arith.constant 0 : index
    %36 = vector.load %arg3[%c0_18, %c0_19, %c0_20] : memref<2x32x384xbf16, #tpu.memory_space<vmem>>, vector<1x32x384xbf16>
    %37 = vector.shape_cast %36 : vector<1x32x384xbf16> to vector<32x384xbf16>
    %cst_21 = arith.constant dense<0.000000e+00> : vector<16x384xf32>
    %38 = tpu.matmul %35, %37, %cst_21 {dimension_numbers = #tpu.dot_dimension_numbers<[1], [0], [0], [1], [0, 0, 1, 1], [], []>} : vector<16x32xbf16>, vector<32x384xbf16>, vector<16x384xf32> -> vector<16x384xf32>
    %39 = vector.broadcast %34 : vector<1x384xf32> to vector<16x384xf32>
    %40 = arith.addf %38, %39 : vector<16x384xf32>
    %41 = vector.extract_strided_slice %40 {offsets = [0, 0], sizes = [16, 32], strides = [1, 1]} : vector<16x384xf32> to vector<16x32xf32>
    %42 = vector.shape_cast %41 : vector<16x32xf32> to vector<2x8x32xf32>
    %43 = vector.extract_strided_slice %40 {offsets = [0, 128], sizes = [16, 32], strides = [1, 1]} : vector<16x384xf32> to vector<16x32xf32>
    %44 = vector.shape_cast %43 : vector<16x32xf32> to vector<2x8x32xf32>
    %45 = vector.extract_strided_slice %40 {offsets = [0, 256], sizes = [16, 32], strides = [1, 1]} : vector<16x384xf32> to vector<16x32xf32>
    %46 = vector.shape_cast %45 : vector<16x32xf32> to vector<2x8x32xf32>
    %47 = vector.shape_cast %42 : vector<2x8x32xf32> to vector<2x1x8x32xf32>
    %48 = vector.broadcast %47 : vector<2x1x8x32xf32> to vector<2x4x8x32xf32>
    %49 = vector.broadcast %28 : vector<1x4x1x32xf32> to vector<2x4x8x32xf32>
    %50 = arith.mulf %48, %49 : vector<2x4x8x32xf32>
    %51 = vector.shape_cast %50 : vector<2x4x8x32xf32> to vector<8x8x32xf32>
    %52 = arith.truncf %51 : vector<8x8x32xf32> to vector<8x8x32xbf16>
    %53 = vector.shape_cast %46 : vector<2x8x32xf32> to vector<2x1x8x32xf32>
    %54 = vector.broadcast %53 : vector<2x1x8x32xf32> to vector<2x4x8x32xf32>
    %55 = vector.broadcast %28 : vector<1x4x1x32xf32> to vector<2x4x8x32xf32>
    %56 = arith.mulf %54, %55 : vector<2x4x8x32xf32>
    %57 = vector.shape_cast %56 : vector<2x4x8x32xf32> to vector<8x8x32xf32>
    %58 = arith.truncf %57 : vector<8x8x32xf32> to vector<8x8x32xbf16>
    %59 = arith.truncf %44 : vector<2x8x32xf32> to vector<2x8x32xbf16>
    %60 = vector.shape_cast %59 : vector<2x8x32xbf16> to vector<2x1x8x32xbf16>
    %61 = vector.shape_cast %60 : vector<2x1x8x32xbf16> to vector<2x1x8x32xbf16>
    %62 = vector.broadcast %61 : vector<2x1x8x32xbf16> to vector<2x4x8x32xbf16>
    %63 = vector.shape_cast %62 : vector<2x4x8x32xbf16> to vector<8x8x32xbf16>
    "tpu.trace_start"() <{level = 10 : i32, message = "bqd,bkd->bqk"}> : () -> ()
    %cst_22 = arith.constant dense<0.000000e+00> : vector<8x8x8xf32>
    %64 = tpu.matmul %52, %63, %cst_22 {dimension_numbers = #tpu.dot_dimension_numbers<[2], [2], [1], [1], [0, 0, 0, 1, 1, 1], [0], [0]>} : vector<8x8x32xbf16>, vector<8x8x32xbf16>, vector<8x8x8xf32> -> vector<8x8x8xf32>
    "tpu.trace_stop"() : () -> ()
    %65 = vector.broadcast %33 : vector<8x1x8xf32> to vector<8x8x8xf32>
    %66 = arith.addf %64, %65 : vector<8x8x8xf32>
    %cst_23 = arith.constant dense<0xFF800000> : vector<8x8xf32>
    %67 = vector.multi_reduction <maximumf>, %66, %cst_23 [2] : vector<8x8x8xf32> to vector<8x8xf32>
    %68 = vector.shape_cast %67 : vector<8x8xf32> to vector<8x8x1xf32>
    %69 = vector.broadcast %68 : vector<8x8x1xf32> to vector<8x8x8xf32>
    %70 = arith.subf %66, %69 : vector<8x8x8xf32>
    %71 = math.exp %70 : vector<8x8x8xf32>
    %cst_24 = arith.constant dense<0.000000e+00> : vector<8x8xf32>
    %72 = vector.multi_reduction <add>, %71, %cst_24 [2] : vector<8x8x8xf32> to vector<8x8xf32>
    %73 = vector.shape_cast %72 : vector<8x8xf32> to vector<8x8x1xf32>
    %74 = tpu.reciprocal %73 {approx = true} : vector<8x8x1xf32> -> vector<8x8x1xf32>
    %75 = vector.broadcast %74 : vector<8x8x1xf32> to vector<8x8x8xf32>
    %76 = arith.mulf %71, %75 : vector<8x8x8xf32>
    %77 = arith.truncf %76 : vector<8x8x8xf32> to vector<8x8x8xbf16>
    "tpu.trace_start"() <{level = 10 : i32, message = "bqk,bkd->bqd"}> : () -> ()
    %cst_25 = arith.constant dense<0.000000e+00> : vector<8x8x32xf32>
    %78 = tpu.matmul %77, %58, %cst_25 {dimension_numbers = #tpu.dot_dimension_numbers<[2], [1], [1], [2], [0, 0, 0, 1, 1, 2], [0], [0]>} : vector<8x8x8xbf16>, vector<8x8x32xbf16>, vector<8x8x32xf32> -> vector<8x8x32xf32>
    "tpu.trace_stop"() : () -> ()
    %79 = vector.shape_cast %78 : vector<8x8x32xf32> to vector<2x4x8x32xf32>
    %cst_26 = arith.constant dense<0.000000e+00> : vector<2x8x32xf32>
    %80 = vector.multi_reduction <add>, %79, %cst_26 [1] : vector<2x4x8x32xf32> to vector<2x8x32xf32>
    %c3 = arith.constant 3 : index
    %c0_27 = arith.constant 0 : index
    %81 = vector.load %arg9[%c3, %c0_27] : memref<20x384xf32, #tpu.memory_space<vmem>>, vector<1x32xf32>
    %82 = vector.shape_cast %80 : vector<2x8x32xf32> to vector<16x32xf32>
    %83 = arith.truncf %82 : vector<16x32xf32> to vector<16x32xbf16>
    %c0_28 = arith.constant 0 : index
    %c0_29 = arith.constant 0 : index
    %c0_30 = arith.constant 0 : index
    %84 = vector.load %arg4[%c0_28, %c0_29, %c0_30] : memref<2x32x32xbf16, #tpu.memory_space<vmem>>, vector<1x32x32xbf16>
    %85 = vector.shape_cast %84 : vector<1x32x32xbf16> to vector<32x32xbf16>
    %cst_31 = arith.constant dense<0.000000e+00> : vector<16x32xf32>
    %86 = tpu.matmul %83, %85, %cst_31 {dimension_numbers = #tpu.dot_dimension_numbers<[1], [0], [0], [1], [0, 0, 1, 1], [], []>} : vector<16x32xbf16>, vector<32x32xbf16>, vector<16x32xf32> -> vector<16x32xf32>
    %87 = vector.broadcast %81 : vector<1x32xf32> to vector<16x32xf32>
    %88 = arith.addf %86, %87 : vector<16x32xf32>
    %c4 = arith.constant 4 : index
    %c0_32 = arith.constant 0 : index
    %89 = vector.load %arg9[%c4, %c0_32] : memref<20x384xf32, #tpu.memory_space<vmem>>, vector<1x32xf32>
    %c5 = arith.constant 5 : index
    %c0_33 = arith.constant 0 : index
    %90 = vector.load %arg9[%c5, %c0_33] : memref<20x384xf32, #tpu.memory_space<vmem>>, vector<1x32xf32>
    %91 = arith.addf %27, %88 : vector<16x32xf32>
    %cst_34 = arith.constant dense<0.000000e+00> : vector<16xf32>
    %92 = vector.multi_reduction <add>, %91, %cst_34 [1] : vector<16x32xf32> to vector<16xf32>
    %93 = vector.shape_cast %92 : vector<16xf32> to vector<16x1xf32>
    %cst_35 = arith.constant 3.200000e+01 : f32
    %94 = vector.broadcast %cst_35 : f32 to vector<16x1xf32>
    %95 = arith.divf %93, %94 : vector<16x1xf32>
    %96 = arith.mulf %91, %91 : vector<16x32xf32>
    %cst_36 = arith.constant dense<0.000000e+00> : vector<16xf32>
    %97 = vector.multi_reduction <add>, %96, %cst_36 [1] : vector<16x32xf32> to vector<16xf32>
    %98 = vector.shape_cast %97 : vector<16xf32> to vector<16x1xf32>
    %cst_37 = arith.constant 3.200000e+01 : f32
    %99 = vector.broadcast %cst_37 : f32 to vector<16x1xf32>
    %100 = arith.divf %98, %99 : vector<16x1xf32>
    %101 = arith.mulf %95, %95 : vector<16x1xf32>
    %102 = arith.subf %100, %101 : vector<16x1xf32>
    %cst_38 = arith.constant 0.000000e+00 : f32
    %103 = vector.broadcast %cst_38 : f32 to vector<16x1xf32>
    %104 = arith.maximumf %102, %103 : vector<16x1xf32>
    %105 = vector.broadcast %95 : vector<16x1xf32> to vector<16x32xf32>
    %106 = arith.subf %91, %105 : vector<16x32xf32>
    %cst_39 = arith.constant 9.99999996E-13 : f32
    %107 = vector.broadcast %cst_39 : f32 to vector<16x1xf32>
    %108 = arith.addf %104, %107 : vector<16x1xf32>
    %109 = math.rsqrt %108 : vector<16x1xf32>
    %110 = vector.broadcast %109 : vector<16x1xf32> to vector<16x32xf32>
    %111 = arith.mulf %106, %110 : vector<16x32xf32>
    %112 = vector.broadcast %89 : vector<1x32xf32> to vector<16x32xf32>
    %113 = arith.mulf %111, %112 : vector<16x32xf32>
    %114 = vector.broadcast %90 : vector<1x32xf32> to vector<16x32xf32>
    %115 = arith.addf %113, %114 : vector<16x32xf32>
    %c6 = arith.constant 6 : index
    %c0_40 = arith.constant 0 : index
    %116 = vector.load %arg9[%c6, %c0_40] : memref<20x384xf32, #tpu.memory_space<vmem>>, vector<1x64xf32>
    %117 = arith.truncf %115 : vector<16x32xf32> to vector<16x32xbf16>
    %c0_41 = arith.constant 0 : index
    %c0_42 = arith.constant 0 : index
    %c0_43 = arith.constant 0 : index
    %118 = vector.load %arg5[%c0_41, %c0_42, %c0_43] : memref<2x32x64xbf16, #tpu.memory_space<vmem>>, vector<1x32x64xbf16>
    %119 = vector.shape_cast %118 : vector<1x32x64xbf16> to vector<32x64xbf16>
    %cst_44 = arith.constant dense<0.000000e+00> : vector<16x64xf32>
    %120 = tpu.matmul %117, %119, %cst_44 {dimension_numbers = #tpu.dot_dimension_numbers<[1], [0], [0], [1], [0, 0, 1, 1], [], []>} : vector<16x32xbf16>, vector<32x64xbf16>, vector<16x64xf32> -> vector<16x64xf32>
    %121 = vector.broadcast %116 : vector<1x64xf32> to vector<16x64xf32>
    %122 = arith.addf %120, %121 : vector<16x64xf32>
    %cst_45 = arith.constant 5.000000e-01 : f32
    %123 = vector.broadcast %cst_45 : f32 to vector<16x64xf32>
    %124 = arith.mulf %123, %122 : vector<16x64xf32>
    %cst_46 = arith.constant 4.471500e-02 : f32
    %125 = vector.broadcast %cst_46 : f32 to vector<16x64xf32>
    %126 = arith.mulf %125, %122 : vector<16x64xf32>
    %127 = arith.mulf %126, %122 : vector<16x64xf32>
    %128 = arith.mulf %127, %122 : vector<16x64xf32>
    %129 = arith.addf %122, %128 : vector<16x64xf32>
    %cst_47 = arith.constant 0.797884583 : f32
    %130 = vector.broadcast %cst_47 : f32 to vector<16x64xf32>
    %131 = arith.mulf %130, %129 : vector<16x64xf32>
    %132 = math.tanh %131 : vector<16x64xf32>
    %cst_48 = arith.constant 1.000000e+00 : f32
    %133 = vector.broadcast %cst_48 : f32 to vector<16x64xf32>
    %134 = arith.addf %133, %132 : vector<16x64xf32>
    %135 = arith.mulf %124, %134 : vector<16x64xf32>
    %c7 = arith.constant 7 : index
    %c0_49 = arith.constant 0 : index
    %136 = vector.load %arg9[%c7, %c0_49] : memref<20x384xf32, #tpu.memory_space<vmem>>, vector<1x32xf32>
    %137 = arith.truncf %135 : vector<16x64xf32> to vector<16x64xbf16>
    %c0_50 = arith.constant 0 : index
    %c0_51 = arith.constant 0 : index
    %c0_52 = arith.constant 0 : index
    %138 = vector.load %arg6[%c0_50, %c0_51, %c0_52] : memref<2x64x32xbf16, #tpu.memory_space<vmem>>, vector<1x64x32xbf16>
    %139 = vector.shape_cast %138 : vector<1x64x32xbf16> to vector<64x32xbf16>
    %cst_53 = arith.constant dense<0.000000e+00> : vector<16x32xf32>
    %140 = tpu.matmul %137, %139, %cst_53 {dimension_numbers = #tpu.dot_dimension_numbers<[1], [0], [0], [1], [0, 0, 1, 1], [], []>} : vector<16x64xbf16>, vector<64x32xbf16>, vector<16x32xf32> -> vector<16x32xf32>
    %141 = vector.broadcast %136 : vector<1x32xf32> to vector<16x32xf32>
    %142 = arith.addf %140, %141 : vector<16x32xf32>
    %c8 = arith.constant 8 : index
    %c0_54 = arith.constant 0 : index
    %143 = vector.load %arg9[%c8, %c0_54] : memref<20x384xf32, #tpu.memory_space<vmem>>, vector<1x32xf32>
    %c9 = arith.constant 9 : index
    %c0_55 = arith.constant 0 : index
    %144 = vector.load %arg9[%c9, %c0_55] : memref<20x384xf32, #tpu.memory_space<vmem>>, vector<1x32xf32>
    %145 = arith.addf %115, %142 : vector<16x32xf32>
    %cst_56 = arith.constant dense<0.000000e+00> : vector<16xf32>
    %146 = vector.multi_reduction <add>, %145, %cst_56 [1] : vector<16x32xf32> to vector<16xf32>
    %147 = vector.shape_cast %146 : vector<16xf32> to vector<16x1xf32>
    %cst_57 = arith.constant 3.200000e+01 : f32
    %148 = vector.broadcast %cst_57 : f32 to vector<16x1xf32>
    %149 = arith.divf %147, %148 : vector<16x1xf32>
    %150 = arith.mulf %145, %145 : vector<16x32xf32>
    %cst_58 = arith.constant dense<0.000000e+00> : vector<16xf32>
    %151 = vector.multi_reduction <add>, %150, %cst_58 [1] : vector<16x32xf32> to vector<16xf32>
    %152 = vector.shape_cast %151 : vector<16xf32> to vector<16x1xf32>
    %cst_59 = arith.constant 3.200000e+01 : f32
    %153 = vector.broadcast %cst_59 : f32 to vector<16x1xf32>
    %154 = arith.divf %152, %153 : vector<16x1xf32>
    %155 = arith.mulf %149, %149 : vector<16x1xf32>
    %156 = arith.subf %154, %155 : vector<16x1xf32>
    %cst_60 = arith.constant 0.000000e+00 : f32
    %157 = vector.broadcast %cst_60 : f32 to vector<16x1xf32>
    %158 = arith.maximumf %156, %157 : vector<16x1xf32>
    %159 = vector.broadcast %149 : vector<16x1xf32> to vector<16x32xf32>
    %160 = arith.subf %145, %159 : vector<16x32xf32>
    %cst_61 = arith.constant 9.99999996E-13 : f32
    %161 = vector.broadcast %cst_61 : f32 to vector<16x1xf32>
    %162 = arith.addf %158, %161 : vector<16x1xf32>
    %163 = math.rsqrt %162 : vector<16x1xf32>
    %164 = vector.broadcast %163 : vector<16x1xf32> to vector<16x32xf32>
    %165 = arith.mulf %160, %164 : vector<16x32xf32>
    %166 = vector.broadcast %143 : vector<1x32xf32> to vector<16x32xf32>
    %167 = arith.mulf %165, %166 : vector<16x32xf32>
    %168 = vector.broadcast %144 : vector<1x32xf32> to vector<16x32xf32>
    %169 = arith.addf %167, %168 : vector<16x32xf32>
    %c10 = arith.constant 10 : index
    %c0_62 = arith.constant 0 : index
    %170 = vector.load %arg9[%c10, %c0_62] : memref<20x384xf32, #tpu.memory_space<vmem>>, vector<1x384xf32>
    %171 = arith.truncf %169 : vector<16x32xf32> to vector<16x32xbf16>
    %c1_63 = arith.constant 1 : index
    %c0_64 = arith.constant 0 : index
    %c0_65 = arith.constant 0 : index
    %172 = vector.load %arg3[%c1_63, %c0_64, %c0_65] : memref<2x32x384xbf16, #tpu.memory_space<vmem>>, vector<1x32x384xbf16>
    %173 = vector.shape_cast %172 : vector<1x32x384xbf16> to vector<32x384xbf16>
    %cst_66 = arith.constant dense<0.000000e+00> : vector<16x384xf32>
    %174 = tpu.matmul %171, %173, %cst_66 {dimension_numbers = #tpu.dot_dimension_numbers<[1], [0], [0], [1], [0, 0, 1, 1], [], []>} : vector<16x32xbf16>, vector<32x384xbf16>, vector<16x384xf32> -> vector<16x384xf32>
    %175 = vector.broadcast %170 : vector<1x384xf32> to vector<16x384xf32>
    %176 = arith.addf %174, %175 : vector<16x384xf32>
    %177 = vector.extract_strided_slice %176 {offsets = [0, 0], sizes = [16, 32], strides = [1, 1]} : vector<16x384xf32> to vector<16x32xf32>
    %178 = vector.shape_cast %177 : vector<16x32xf32> to vector<2x8x32xf32>
    %179 = vector.extract_strided_slice %176 {offsets = [0, 128], sizes = [16, 32], strides = [1, 1]} : vector<16x384xf32> to vector<16x32xf32>
    %180 = vector.shape_cast %179 : vector<16x32xf32> to vector<2x8x32xf32>
    %181 = vector.extract_strided_slice %176 {offsets = [0, 256], sizes = [16, 32], strides = [1, 1]} : vector<16x384xf32> to vector<16x32xf32>
    %182 = vector.shape_cast %181 : vector<16x32xf32> to vector<2x8x32xf32>
    %183 = vector.shape_cast %178 : vector<2x8x32xf32> to vector<2x1x8x32xf32>
    %184 = vector.broadcast %183 : vector<2x1x8x32xf32> to vector<2x4x8x32xf32>
    %185 = vector.broadcast %28 : vector<1x4x1x32xf32> to vector<2x4x8x32xf32>
    %186 = arith.mulf %184, %185 : vector<2x4x8x32xf32>
    %187 = vector.shape_cast %186 : vector<2x4x8x32xf32> to vector<8x8x32xf32>
    %188 = arith.truncf %187 : vector<8x8x32xf32> to vector<8x8x32xbf16>
    %189 = vector.shape_cast %182 : vector<2x8x32xf32> to vector<2x1x8x32xf32>
    %190 = vector.broadcast %189 : vector<2x1x8x32xf32> to vector<2x4x8x32xf32>
    %191 = vector.broadcast %28 : vector<1x4x1x32xf32> to vector<2x4x8x32xf32>
    %192 = arith.mulf %190, %191 : vector<2x4x8x32xf32>
    %193 = vector.shape_cast %192 : vector<2x4x8x32xf32> to vector<8x8x32xf32>
    %194 = arith.truncf %193 : vector<8x8x32xf32> to vector<8x8x32xbf16>
    %195 = arith.truncf %180 : vector<2x8x32xf32> to vector<2x8x32xbf16>
    %196 = vector.shape_cast %195 : vector<2x8x32xbf16> to vector<2x1x8x32xbf16>
    %197 = vector.shape_cast %196 : vector<2x1x8x32xbf16> to vector<2x1x8x32xbf16>
    %198 = vector.broadcast %197 : vector<2x1x8x32xbf16> to vector<2x4x8x32xbf16>
    %199 = vector.shape_cast %198 : vector<2x4x8x32xbf16> to vector<8x8x32xbf16>
    "tpu.trace_start"() <{level = 10 : i32, message = "bqd,bkd->bqk"}> : () -> ()
    %cst_67 = arith.constant dense<0.000000e+00> : vector<8x8x8xf32>
    %200 = tpu.matmul %188, %199, %cst_67 {dimension_numbers = #tpu.dot_dimension_numbers<[2], [2], [1], [1], [0, 0, 0, 1, 1, 1], [0], [0]>} : vector<8x8x32xbf16>, vector<8x8x32xbf16>, vector<8x8x8xf32> -> vector<8x8x8xf32>
    "tpu.trace_stop"() : () -> ()
    %201 = vector.broadcast %33 : vector<8x1x8xf32> to vector<8x8x8xf32>
    %202 = arith.addf %200, %201 : vector<8x8x8xf32>
    %cst_68 = arith.constant dense<0xFF800000> : vector<8x8xf32>
    %203 = vector.multi_reduction <maximumf>, %202, %cst_68 [2] : vector<8x8x8xf32> to vector<8x8xf32>
    %204 = vector.shape_cast %203 : vector<8x8xf32> to vector<8x8x1xf32>
    %205 = vector.broadcast %204 : vector<8x8x1xf32> to vector<8x8x8xf32>
    %206 = arith.subf %202, %205 : vector<8x8x8xf32>
    %207 = math.exp %206 : vector<8x8x8xf32>
    %cst_69 = arith.constant dense<0.000000e+00> : vector<8x8xf32>
    %208 = vector.multi_reduction <add>, %207, %cst_69 [2] : vector<8x8x8xf32> to vector<8x8xf32>
    %209 = vector.shape_cast %208 : vector<8x8xf32> to vector<8x8x1xf32>
    %210 = tpu.reciprocal %209 {approx = true} : vector<8x8x1xf32> -> vector<8x8x1xf32>
    %211 = vector.broadcast %210 : vector<8x8x1xf32> to vector<8x8x8xf32>
    %212 = arith.mulf %207, %211 : vector<8x8x8xf32>
    %213 = arith.truncf %212 : vector<8x8x8xf32> to vector<8x8x8xbf16>
    "tpu.trace_start"() <{level = 10 : i32, message = "bqk,bkd->bqd"}> : () -> ()
    %cst_70 = arith.constant dense<0.000000e+00> : vector<8x8x32xf32>
    %214 = tpu.matmul %213, %194, %cst_70 {dimension_numbers = #tpu.dot_dimension_numbers<[2], [1], [1], [2], [0, 0, 0, 1, 1, 2], [0], [0]>} : vector<8x8x8xbf16>, vector<8x8x32xbf16>, vector<8x8x32xf32> -> vector<8x8x32xf32>
    "tpu.trace_stop"() : () -> ()
    %215 = vector.shape_cast %214 : vector<8x8x32xf32> to vector<2x4x8x32xf32>
    %cst_71 = arith.constant dense<0.000000e+00> : vector<2x8x32xf32>
    %216 = vector.multi_reduction <add>, %215, %cst_71 [1] : vector<2x4x8x32xf32> to vector<2x8x32xf32>
    %c11 = arith.constant 11 : index
    %c0_72 = arith.constant 0 : index
    %217 = vector.load %arg9[%c11, %c0_72] : memref<20x384xf32, #tpu.memory_space<vmem>>, vector<1x32xf32>
    %218 = vector.shape_cast %216 : vector<2x8x32xf32> to vector<16x32xf32>
    %219 = arith.truncf %218 : vector<16x32xf32> to vector<16x32xbf16>
    %c1_73 = arith.constant 1 : index
    %c0_74 = arith.constant 0 : index
    %c0_75 = arith.constant 0 : index
    %220 = vector.load %arg4[%c1_73, %c0_74, %c0_75] : memref<2x32x32xbf16, #tpu.memory_space<vmem>>, vector<1x32x32xbf16>
    %221 = vector.shape_cast %220 : vector<1x32x32xbf16> to vector<32x32xbf16>
    %cst_76 = arith.constant dense<0.000000e+00> : vector<16x32xf32>
    %222 = tpu.matmul %219, %221, %cst_76 {dimension_numbers = #tpu.dot_dimension_numbers<[1], [0], [0], [1], [0, 0, 1, 1], [], []>} : vector<16x32xbf16>, vector<32x32xbf16>, vector<16x32xf32> -> vector<16x32xf32>
    %223 = vector.broadcast %217 : vector<1x32xf32> to vector<16x32xf32>
    %224 = arith.addf %222, %223 : vector<16x32xf32>
    %c12 = arith.constant 12 : index
    %c0_77 = arith.constant 0 : index
    %225 = vector.load %arg9[%c12, %c0_77] : memref<20x384xf32, #tpu.memory_space<vmem>>, vector<1x32xf32>
    %c13 = arith.constant 13 : index
    %c0_78 = arith.constant 0 : index
    %226 = vector.load %arg9[%c13, %c0_78] : memref<20x384xf32, #tpu.memory_space<vmem>>, vector<1x32xf32>
    %227 = arith.addf %169, %224 : vector<16x32xf32>
    %cst_79 = arith.constant dense<0.000000e+00> : vector<16xf32>
    %228 = vector.multi_reduction <add>, %227, %cst_79 [1] : vector<16x32xf32> to vector<16xf32>
    %229 = vector.shape_cast %228 : vector<16xf32> to vector<16x1xf32>
    %cst_80 = arith.constant 3.200000e+01 : f32
    %230 = vector.broadcast %cst_80 : f32 to vector<16x1xf32>
    %231 = arith.divf %229, %230 : vector<16x1xf32>
    %232 = arith.mulf %227, %227 : vector<16x32xf32>
    %cst_81 = arith.constant dense<0.000000e+00> : vector<16xf32>
    %233 = vector.multi_reduction <add>, %232, %cst_81 [1] : vector<16x32xf32> to vector<16xf32>
    %234 = vector.shape_cast %233 : vector<16xf32> to vector<16x1xf32>
    %cst_82 = arith.constant 3.200000e+01 : f32
    %235 = vector.broadcast %cst_82 : f32 to vector<16x1xf32>
    %236 = arith.divf %234, %235 : vector<16x1xf32>
    %237 = arith.mulf %231, %231 : vector<16x1xf32>
    %238 = arith.subf %236, %237 : vector<16x1xf32>
    %cst_83 = arith.constant 0.000000e+00 : f32
    %239 = vector.broadcast %cst_83 : f32 to vector<16x1xf32>
    %240 = arith.maximumf %238, %239 : vector<16x1xf32>
    %241 = vector.broadcast %231 : vector<16x1xf32> to vector<16x32xf32>
    %242 = arith.subf %227, %241 : vector<16x32xf32>
    %cst_84 = arith.constant 9.99999996E-13 : f32
    %243 = vector.broadcast %cst_84 : f32 to vector<16x1xf32>
    %244 = arith.addf %240, %243 : vector<16x1xf32>
    %245 = math.rsqrt %244 : vector<16x1xf32>
    %246 = vector.broadcast %245 : vector<16x1xf32> to vector<16x32xf32>
    %247 = arith.mulf %242, %246 : vector<16x32xf32>
    %248 = vector.broadcast %225 : vector<1x32xf32> to vector<16x32xf32>
    %249 = arith.mulf %247, %248 : vector<16x32xf32>
    %250 = vector.broadcast %226 : vector<1x32xf32> to vector<16x32xf32>
    %251 = arith.addf %249, %250 : vector<16x32xf32>
    %c14 = arith.constant 14 : index
    %c0_85 = arith.constant 0 : index
    %252 = vector.load %arg9[%c14, %c0_85] : memref<20x384xf32, #tpu.memory_space<vmem>>, vector<1x64xf32>
    %253 = arith.truncf %251 : vector<16x32xf32> to vector<16x32xbf16>
    %c1_86 = arith.constant 1 : index
    %c0_87 = arith.constant 0 : index
    %c0_88 = arith.constant 0 : index
    %254 = vector.load %arg5[%c1_86, %c0_87, %c0_88] : memref<2x32x64xbf16, #tpu.memory_space<vmem>>, vector<1x32x64xbf16>
    %255 = vector.shape_cast %254 : vector<1x32x64xbf16> to vector<32x64xbf16>
    %cst_89 = arith.constant dense<0.000000e+00> : vector<16x64xf32>
    %256 = tpu.matmul %253, %255, %cst_89 {dimension_numbers = #tpu.dot_dimension_numbers<[1], [0], [0], [1], [0, 0, 1, 1], [], []>} : vector<16x32xbf16>, vector<32x64xbf16>, vector<16x64xf32> -> vector<16x64xf32>
    %257 = vector.broadcast %252 : vector<1x64xf32> to vector<16x64xf32>
    %258 = arith.addf %256, %257 : vector<16x64xf32>
    %cst_90 = arith.constant 5.000000e-01 : f32
    %259 = vector.broadcast %cst_90 : f32 to vector<16x64xf32>
    %260 = arith.mulf %259, %258 : vector<16x64xf32>
    %cst_91 = arith.constant 4.471500e-02 : f32
    %261 = vector.broadcast %cst_91 : f32 to vector<16x64xf32>
    %262 = arith.mulf %261, %258 : vector<16x64xf32>
    %263 = arith.mulf %262, %258 : vector<16x64xf32>
    %264 = arith.mulf %263, %258 : vector<16x64xf32>
    %265 = arith.addf %258, %264 : vector<16x64xf32>
    %cst_92 = arith.constant 0.797884583 : f32
    %266 = vector.broadcast %cst_92 : f32 to vector<16x64xf32>
    %267 = arith.mulf %266, %265 : vector<16x64xf32>
    %268 = math.tanh %267 : vector<16x64xf32>
    %cst_93 = arith.constant 1.000000e+00 : f32
    %269 = vector.broadcast %cst_93 : f32 to vector<16x64xf32>
    %270 = arith.addf %269, %268 : vector<16x64xf32>
    %271 = arith.mulf %260, %270 : vector<16x64xf32>
    %c15 = arith.constant 15 : index
    %c0_94 = arith.constant 0 : index
    %272 = vector.load %arg9[%c15, %c0_94] : memref<20x384xf32, #tpu.memory_space<vmem>>, vector<1x32xf32>
    %273 = arith.truncf %271 : vector<16x64xf32> to vector<16x64xbf16>
    %c1_95 = arith.constant 1 : index
    %c0_96 = arith.constant 0 : index
    %c0_97 = arith.constant 0 : index
    %274 = vector.load %arg6[%c1_95, %c0_96, %c0_97] : memref<2x64x32xbf16, #tpu.memory_space<vmem>>, vector<1x64x32xbf16>
    %275 = vector.shape_cast %274 : vector<1x64x32xbf16> to vector<64x32xbf16>
    %cst_98 = arith.constant dense<0.000000e+00> : vector<16x32xf32>
    %276 = tpu.matmul %273, %275, %cst_98 {dimension_numbers = #tpu.dot_dimension_numbers<[1], [0], [0], [1], [0, 0, 1, 1], [], []>} : vector<16x64xbf16>, vector<64x32xbf16>, vector<16x32xf32> -> vector<16x32xf32>
    %277 = vector.broadcast %272 : vector<1x32xf32> to vector<16x32xf32>
    %278 = arith.addf %276, %277 : vector<16x32xf32>
    %c16 = arith.constant 16 : index
    %c0_99 = arith.constant 0 : index
    %279 = vector.load %arg9[%c16, %c0_99] : memref<20x384xf32, #tpu.memory_space<vmem>>, vector<1x32xf32>
    %c17 = arith.constant 17 : index
    %c0_100 = arith.constant 0 : index
    %280 = vector.load %arg9[%c17, %c0_100] : memref<20x384xf32, #tpu.memory_space<vmem>>, vector<1x32xf32>
    %281 = arith.addf %251, %278 : vector<16x32xf32>
    %cst_101 = arith.constant dense<0.000000e+00> : vector<16xf32>
    %282 = vector.multi_reduction <add>, %281, %cst_101 [1] : vector<16x32xf32> to vector<16xf32>
    %283 = vector.shape_cast %282 : vector<16xf32> to vector<16x1xf32>
    %cst_102 = arith.constant 3.200000e+01 : f32
    %284 = vector.broadcast %cst_102 : f32 to vector<16x1xf32>
    %285 = arith.divf %283, %284 : vector<16x1xf32>
    %286 = arith.mulf %281, %281 : vector<16x32xf32>
    %cst_103 = arith.constant dense<0.000000e+00> : vector<16xf32>
    %287 = vector.multi_reduction <add>, %286, %cst_103 [1] : vector<16x32xf32> to vector<16xf32>
    %288 = vector.shape_cast %287 : vector<16xf32> to vector<16x1xf32>
    %cst_104 = arith.constant 3.200000e+01 : f32
    %289 = vector.broadcast %cst_104 : f32 to vector<16x1xf32>
    %290 = arith.divf %288, %289 : vector<16x1xf32>
    %291 = arith.mulf %285, %285 : vector<16x1xf32>
    %292 = arith.subf %290, %291 : vector<16x1xf32>
    %cst_105 = arith.constant 0.000000e+00 : f32
    %293 = vector.broadcast %cst_105 : f32 to vector<16x1xf32>
    %294 = arith.maximumf %292, %293 : vector<16x1xf32>
    %295 = vector.broadcast %285 : vector<16x1xf32> to vector<16x32xf32>
    %296 = arith.subf %281, %295 : vector<16x32xf32>
    %cst_106 = arith.constant 9.99999996E-13 : f32
    %297 = vector.broadcast %cst_106 : f32 to vector<16x1xf32>
    %298 = arith.addf %294, %297 : vector<16x1xf32>
    %299 = math.rsqrt %298 : vector<16x1xf32>
    %300 = vector.broadcast %299 : vector<16x1xf32> to vector<16x32xf32>
    %301 = arith.mulf %296, %300 : vector<16x32xf32>
    %302 = vector.broadcast %279 : vector<1x32xf32> to vector<16x32xf32>
    %303 = arith.mulf %301, %302 : vector<16x32xf32>
    %304 = vector.broadcast %280 : vector<1x32xf32> to vector<16x32xf32>
    %305 = arith.addf %303, %304 : vector<16x32xf32>
    %306 = vector.shape_cast %305 : vector<16x32xf32> to vector<2x8x32xf32>
    %307 = vector.extract_strided_slice %306 {offsets = [0, 0, 0], sizes = [2, 1, 32], strides = [1, 1, 1]} : vector<2x8x32xf32> to vector<2x1x32xf32>
    %308 = vector.shape_cast %307 : vector<2x1x32xf32> to vector<2x32xf32>
    %c18 = arith.constant 18 : index
    %c0_107 = arith.constant 0 : index
    %309 = vector.load %arg9[%c18, %c0_107] : memref<20x384xf32, #tpu.memory_space<vmem>>, vector<1x32xf32>
    %310 = arith.truncf %308 : vector<2x32xf32> to vector<2x32xbf16>
    %c0_108 = arith.constant 0 : index
    %c0_109 = arith.constant 0 : index
    %311 = vector.load %arg7[%c0_108, %c0_109] : memref<32x32xbf16, #tpu.memory_space<vmem>>, vector<32x32xbf16>
    %cst_110 = arith.constant dense<0.000000e+00> : vector<2x32xf32>
    %312 = tpu.matmul %310, %311, %cst_110 {dimension_numbers = #tpu.dot_dimension_numbers<[1], [0], [0], [1], [0, 0, 1, 1], [], []>} : vector<2x32xbf16>, vector<32x32xbf16>, vector<2x32xf32> -> vector<2x32xf32>
    %313 = vector.broadcast %309 : vector<1x32xf32> to vector<2x32xf32>
    %314 = arith.addf %312, %313 : vector<2x32xf32>
    %315 = math.tanh %314 : vector<2x32xf32>
    %c19 = arith.constant 19 : index
    %c0_111 = arith.constant 0 : index
    %316 = vector.load %arg9[%c19, %c0_111] : memref<20x384xf32, #tpu.memory_space<vmem>>, vector<1x3xf32>
    %317 = arith.truncf %315 : vector<2x32xf32> to vector<2x32xbf16>
    %c0_112 = arith.constant 0 : index
    %c0_113 = arith.constant 0 : index
    %318 = vector.load %arg8[%c0_112, %c0_113] : memref<32x3xbf16, #tpu.memory_space<vmem>>, vector<32x3xbf16>
    %cst_114 = arith.constant dense<0.000000e+00> : vector<2x3xf32>
    %319 = tpu.matmul %317, %318, %cst_114 {dimension_numbers = #tpu.dot_dimension_numbers<[1], [0], [0], [1], [0, 0, 1, 1], [], []>} : vector<2x32xbf16>, vector<32x3xbf16>, vector<2x3xf32> -> vector<2x3xf32>
    %320 = vector.broadcast %316 : vector<1x3xf32> to vector<2x3xf32>
    %321 = arith.addf %319, %320 : vector<2x3xf32>
    %322 = vector.shape_cast %321 : vector<2x3xf32> to vector<2x1x3xf32>
    %c0_115 = arith.constant 0 : index
    %c0_116 = arith.constant 0 : index
    %c0_117 = arith.constant 0 : index
    %323 = vector.load %arg10[%c0_115, %c0_116, %c0_117] : memref<2x1x3xf32, #tpu.memory_space<vmem>>, vector<2x1x3xf32>
    tpu.vector_store %arg10[%c0_115, %c0_116, %c0_117], %322 {strides = array<i32>} : memref<2x1x3xf32, #tpu.memory_space<vmem>>, vector<2x1x3xf32>,
    return
  }
}

</mosaic_0001>

<bundles_post_ra>
// kernel: financial_risk_classifier.1
= control target key start
LH: loop header
LB: loop body
LE: loop exit
PB: predicated region body
PF: predicated region fallthrough
CT: control target
= control target key end

     0   :  { %vm41_vm0 = vcmask 261120   ;;  %s4281_s0 = inlined_call_operand.vmem [shape: f32[2,8,32], index: 0, kind: input, shape index: {}]   ;;  %s4282_s1 = inlined_call_operand.vmem [shape: f32[2,1,8], index: 1, kind: input, shape index: {}]   ;;  %s4283_s2 = inlined_call_operand.vmem [shape: f32[1,4,1,32], index: 2, kind: input, shape index: {}]   ;;  %s4284_s3 = inlined_call_operand.vmem [shape: bf16[2,32,384], index: 3, kind: input, shape index: {}]   ;;  %s4285_s4 = inlined_call_operand.vmem [shape: bf16[2,32,32], index: 4, kind: input, shape index: {}]   ;;  %s4286_s5 = inlined_call_operand.vmem [shape: bf16[2,32,64], index: 5, kind: input, shape index: {}]   ;;  %s4287_s6 = inlined_call_operand.vmem [shape: bf16[2,64,32], index: 6, kind: input, shape index: {}]   ;;  %s4288_s7 = inlined_call_operand.vmem [shape: bf16[32,32], index: 7, kind: input, shape index: {}]   ;;  %s4289_s8 = inlined_call_operand.vmem [shape: bf16[32,3], index: 8, kind: input, shape index: {}]   ;;  %s4290_s9 = inlined_call_operand.vmem [shape: f32[20,384], index: 9, kind: input, shape index: {}]   ;;  %s4291_s10 = inlined_call_operand.hbm [shape: f32[2,1,3], index: 10, kind: output, shape index: {}]  }
   0x1   :  { %v37_v0 = vld [vmem:[%s4281_s0] sm:$0xff]  ;;  %v38_v1 = vld [vmem:[%s4281_s0 + $0x8] sm:$0xff] }
   0x2   :  { %v42_v2 = vsel %vm41_vm0, %v37_v0, 0.0  ;;  %v51_v3 = vmul.f32 %v37_v0, %v37_v0  ;;  %v52_v4 = vmul.f32 %v38_v1, %v38_v1  ;;  %v45_v5 = vsel %vm41_vm0, %v38_v1, 0.0 }
   0x3   :  { %43 = vadd.xlane.f32.xlu0 %v42_v2 }
   0x4   :  { %v53_v6 = vsel %vm41_vm0, %v51_v3, 0.0  ;;  %v56_v7 = vsel %vm41_vm0, %v52_v4, 0.0 }
   0x5   :  { %54 = vadd.xlane.f32.xlu1 %v53_v6 }
   0x7   :  { %46 = vadd.xlane.f32.xlu0 %v45_v5 }
   0x9   :  { %57 = vadd.xlane.f32.xlu1 %v56_v7 }
   0xa   :  { %15 = vsyncpa [#allocation3], 0  ;;  %v3413_v8 = vld [vmem:[%s4284_s3 + $0x4] ss:$12 sps:$4 sm:$0xff]   ;;  %v3415_v9 = vld [vmem:[%s4284_s3] ss:$12 sps:$4 sm:$0xff]   ;;  %v97_v45 = vlaneseq }
   0xb   :  { %v3573_v10 = vmov 0.0   ;;  %v3416_v11 = vld [vmem:[%s4284_s3 + $0x8] ss:$12 sps:$4 sm:$0xff]   ;;  %v3574_v13 = vmov 0   ;;  %147 = vmatprep.subr.bf16.mxu0 %v3413_v8  ;;  %v3419_v14 = vld [vmem:[%s4284_s3 + $0x18] ss:$12 sps:$4 sm:$0xff]  }
   0xc   :  { %3126 = vmatprep.subr.bf16.mxu1 %v3573_v10  ;;  %v3417_v12 = vld [vmem:[%s4284_s3 + $0x1c] ss:$12 sps:$4 sm:$0xff]   ;;  %179 = vmatprep.mubr.bf16.mxu0 %v3574_v13  ;;  %v3420_v15 = vld [vmem:[%s4284_s3 + $0x20] ss:$12 sps:$4 sm:$0xff]   ;;  %vm3575_vm1 = vmmov 0   ;;  %v3688_v46 = vshrl.u32 %v97_v45, 7 }
   0xd   :  { %148 = vmatpush1.bf16.msra.mxu0 %v3415_v9  ;;  %3127 = vmatpush3.bf16.msra.mxu1 %v3416_v11  ;;  %v39_v35 = vld [vmem:[%s4290_s9] ss:$0 sm:$0xff]  ;;  %v40_v40 = vld [vmem:[%s4290_s9 + $0x1] ss:$0 sm:$0xff]  ;;  %v3722_v9 = vld [vmem:[%s4283_s2 + $0x2] ss:$0 sm:$0xff] }
   0xe   :  { %149 = vmatprep.subr.bf16.mxu0 %v3417_v12  ;;  %3128 = vmatprep.subr.bf16.mxu1 %v3573_v10  ;;  %v103_v47 = vsub.s32 1, %v3688_v46  ;;  %v2920_v48 = vld [vmem:[%s4290_s9 + $0x2] ss:$8 sm:$0x7]  ;;  %v99_v49 = vsub.s32 0, %v3688_v46  ;;  %v107_v50 = vsub.s32 2, %v3688_v46 }
   0xf   :  { %3130 = vmatprep.mubr.msk.bf16.mxu1 %vm3575_vm1, %v3573_v10  ;;  %v3707_v2 = vld [vmem:[%s4283_s2] ss:$0 sm:$0xff]  ;;  %v3712_v3 = vld [vmem:[%s4283_s2 + $0x1] ss:$0 sm:$0xff]  ;;  %v3727_v11 = vld [vmem:[%s4283_s2 + $0x3] ss:$0 sm:$0xff] }
  0x10   :  { %v104_v51 = vrot.slane %v2920_v48, %v103_v47  ;;  %v100_v52 = vrot.slane %v2920_v48, %v99_v49  ;;  %v108_v57 = vrot.slane %v2920_v48, %v107_v50  ;;  %vm751_vm2 = vcmask 1043456   ;;  %s3577_s26 = smov [#allocation2]  }
  0x11   :  { %150 = vmatpush1.bf16.msra.mxu0 %v3419_v14  ;;  %3129 = vmatpush3.bf16.msra.mxu1 %v3420_v15  ;;  %vm651_vm3 = vcmask 64512   ;;  %vm1347_vm4 = vcmask 523264   ;;  %vm2756_vm5 = vcmask 1041409   ;;  %vm2901_vm6 = vcmask 16384  }
  0x12   :  { %3134 = vmatprep.subr.bf16.mxu0 %v3573_v10  ;;  %3140 = vmatprep.subr.bf16.mxu1 %v3573_v10 }
  0x90   :  { %v44_v16 = vpop.xlane.xlu0 %43 }
  0x91   :  { %v49_v17 = vmul.f32 0.03125, %v44_v16 }
  0x92   :  { %v55_v18 = vpop.xlane.xlu1 %54 }
  0x93   :  { %v61_v19 = vmul.f32 %v49_v17, %v49_v17  ;;  %v59_v20 = vmul.f32 0.03125, %v55_v18  ;;  %v67_v32 = vsub.f32 %v37_v0, %v49_v17 }
  0x94   :  { %v47_v21 = vpop.xlane.xlu0 %46 }
  0x95   :  { %v63_v22 = vsub.f32 %v59_v20, %v61_v19  ;;  %v50_v23 = vmul.f32 0.03125, %v47_v21 }
  0x96   :  { %v58_v24 = vpop.xlane.xlu1 %57 }
  0x97   :  { %v65_v25 = vmax.f32 %v63_v22, 0.0  ;;  %v62_v26 = vmul.f32 %v50_v23, %v50_v23  ;;  %v60_v27 = vmul.f32 0.03125, %v58_v24  ;;  %v68_v36 = vsub.f32 %v38_v1, %v50_v23 }
  0x99   :  { %v69_v28 = vadd.f32 1e-12, %v65_v25  ;;  %v64_v29 = vsub.f32 %v60_v27, %v62_v26 }
  0x9b   :  { %3449 = vrsqrt.f32 %v69_v28  ;;  %v66_v30 = vmax.f32 %v64_v29, 0.0 }
  0x9d   :  { %v70_v31 = vadd.f32 1e-12, %v66_v30 }
  0x9f   :  { %3451 = vrsqrt.f32 %v70_v31 }
  0xa5   :  { %v3450_v33 = vpop.eup %3449 }
  0xa6   :  { %v73_v34 = vmul.f32 %v3450_v33, %v67_v32 }
  0xa8   :  { %v75_v39 = vmul.f32 %v73_v34, %v39_v35 }
  0xa9   :  { %v3452_v37 = vpop.eup %3451 }
  0xaa   :  { %v74_v38 = vmul.f32 %v3452_v37, %v68_v36  ;;  %v3676_v42 = vadd.f32 %v75_v39, %v40_v40  ;;  %v3779_v36 = vld [vmem:[%s4282_s1] ss:$0 sm:$0xff] }
  0xac   :  { %v76_v41 = vmul.f32 %v74_v38, %v39_v35 }
  0xae   :  { %v3678_v43 = vadd.f32 %v76_v41, %v40_v40 }
  0xb0   :  { %v87_v44 = vpack.c.bf16 %v3678_v43, %v3676_v42 }
  0xb2   :  { %2927 = vmatmul.mubr.msk.bf16.vlgmr.msra.gmra.mrb[0].mxu0 %vm41_vm0, %v87_v44  ;;  %3131 = vmatmul.mubr.msk.bf16.vlgmr.msra.gmra.mrb[0].mxu1 %vm41_vm0, %v87_v44 }
  0xb3   :  { %3136 = vmatprep.mubr.msk.bf16.mxu0 %vm3575_vm1, %v3573_v10  ;;  %3142 = vmatprep.mubr.msk.bf16.mxu1 %vm3575_vm1, %v3573_v10 }
 0x185   :  { %v181_v53 = vpop.f32.mrb[0].mxu0  ;;  %v224_v54 = vpop.f32.mrb[0].mxu1 }
 0x186   :  { %v183_v55 = vpop.f32.mrb[1].mxu0  ;;  %v3132_v56 = vpop.f32.mrb[1].mxu1  ;;  %v182_v63 = vadd.f32 %v181_v53, %v100_v52  ;;  %v3750_v23 = vadd.f32 %v224_v54, %v108_v57 }
 0x187   :  { %v184_v58 = vadd.f32 %v183_v55, %v104_v51  ;;  %v185_v59 = vpop.f32.mrb[2].mxu0  ;;  %v227_v60 = vpop.f32.mrb[2].mxu1 }
 0x188   :  { %v187_v61 = vpop.f32.mrb[3].mxu0  ;;  %v3133_v62 = vpop.f32.mrb[3].mxu1  ;;  %v3702_v1 = vadd.f32 %v227_v60, %v108_v57  ;;  %v255_v5 = vmul.f32 %v3707_v2, %v182_v63  ;;  %v256_v6 = vmul.f32 %v3712_v3, %v182_v63  ;;  %v257_v14 = vmul.f32 %v3722_v9, %v182_v63 }
 0x189   :  { %v287_v0 = vpack.c.bf16 %v184_v58, %v184_v58  ;;  %v188_v12 = vadd.f32 %v187_v61, %v104_v51  ;;  %v258_v15 = vmul.f32 %v3727_v11, %v182_v63  ;;  %v186_v19 = vadd.f32 %v185_v59, %v100_v52 }
 0x18a   :  { %v263_v7 = vpack.c.bf16 %v255_v5, %v255_v5  ;;  %v264_v8 = vpack.c.bf16 %v256_v6, %v256_v6  ;;  %v265_v17 = vpack.c.bf16 %v257_v14, %v257_v14  ;;  %v271_v26 = vmul.f32 %v3707_v2, %v3750_v23  ;;  %v3792_v6 = vld [vmem:[%s4282_s1 + $0x1] ss:$0 sm:$0xff] }
 0x18b   :  { %v305_v4 = vsel %vm41_vm0, %v287_v0, 0  ;;  %v288_v16 = vpack.c.bf16 %v188_v12, %v188_v12  ;;  %v266_v18 = vpack.c.bf16 %v258_v15, %v258_v15  ;;  %v259_v21 = vmul.f32 %v3707_v2, %v186_v19 }
 0x18c   :  { %3135 = vmatpush3.bf16.xpose.msra.mxu0 %v305_v4  ;;  %3141 = vmatpush3.bf16.xpose.msra.mxu1 %v305_v4  ;;  %v260_v22 = vmul.f32 %v3712_v3, %v186_v19  ;;  %v272_v27 = vmul.f32 %v3712_v3, %v3750_v23  ;;  %v261_v28 = vmul.f32 %v3722_v9, %v186_v19 }
 0x18d   :  { %3146 = vmatprep.subr.bf16.mxu0 %v3573_v10  ;;  %3152 = vmatprep.subr.bf16.mxu1 %v3573_v10  ;;  %v480_v20 = vsel %vm41_vm0, %v288_v16, 0  ;;  %v267_v24 = vpack.c.bf16 %v259_v21, %v259_v21  ;;  %v262_v29 = vmul.f32 %v3727_v11, %v186_v19  ;;  %v279_v30 = vpack.c.bf16 %v271_v26, %v271_v26 }
 0x18e   :  { %v268_v25 = vpack.c.bf16 %v260_v22, %v260_v22  ;;  %v280_v31 = vpack.c.bf16 %v272_v27, %v272_v27  ;;  %v269_v32 = vpack.c.bf16 %v261_v28, %v261_v28 }
 0x18f   :  { %v270_v33 = vpack.c.bf16 %v262_v29, %v262_v29  ;;  %v753_v34 = vsel %vm751_vm2, %v279_v30, 0 }
 0x190   :  { %v799_v35 = vsel %vm751_vm2, %v280_v31, 0 }
 0x193   :  { %3137 = vmatmul.mubr.msk.bf16.vlgmr.msra.gmra.mrb[4].mxu0 %vm41_vm0, %v263_v7  ;;  %3143 = vmatmul.mubr.msk.bf16.vlgmr.msra.gmra.mrb[4].mxu1 %vm41_vm0, %v264_v8 }
 0x194   :  { %3147 = vmatpush3.bf16.xpose.msra.mxu0 %v305_v4  ;;  %3153 = vmatpush3.bf16.xpose.msra.mxu1 %v305_v4 }
 0x195   :  { %3148 = vmatprep.mubr.msk.bf16.mxu0 %vm3575_vm1, %v3573_v10  ;;  %3154 = vmatprep.mubr.msk.bf16.mxu1 %vm3575_vm1, %v3573_v10 }
 0x196   :  { %3158 = vmatprep.subr.bf16.mxu0 %v3573_v10  ;;  %3164 = vmatprep.subr.bf16.mxu1 %v3573_v10 }
 0x19b   :  { %3149 = vmatmul.mubr.msk.bf16.vlgmr.msra.gmra.mrb[8].mxu0 %vm41_vm0, %v265_v17  ;;  %3155 = vmatmul.mubr.msk.bf16.vlgmr.msra.gmra.mrb[8].mxu1 %vm41_vm0, %v266_v18 }
 0x19c   :  { %3159 = vmatpush3.bf16.xpose.msra.mxu0 %v480_v20  ;;  %3165 = vmatpush3.bf16.xpose.msra.mxu1 %v480_v20 }
 0x19d   :  { %3160 = vmatprep.mubr.msk.bf16.mxu0 %vm3575_vm1, %v3573_v10  ;;  %3166 = vmatprep.mubr.msk.bf16.mxu1 %vm3575_vm1, %v3573_v10 }
 0x19e   :  { %3170 = vmatprep.subr.bf16.mxu0 %v3573_v10  ;;  %3176 = vmatprep.subr.bf16.mxu1 %v3573_v10 }
 0x1a3   :  { %3161 = vmatmul.mubr.msk.bf16.vlgmr.msra.gmra.mrb[12].mxu0 %vm41_vm0, %v267_v24  ;;  %3167 = vmatmul.mubr.msk.bf16.vlgmr.msra.gmra.mrb[12].mxu1 %vm41_vm0, %v268_v25 }
 0x1a4   :  { %3171 = vmatpush3.bf16.xpose.msra.mxu0 %v480_v20  ;;  %3177 = vmatpush3.bf16.xpose.msra.mxu1 %v480_v20 }
 0x1a5   :  { %3172 = vmatprep.mubr.msk.bf16.mxu0 %vm3575_vm1, %v3573_v10  ;;  %3178 = vmatprep.mubr.msk.bf16.mxu1 %vm3575_vm1, %v3573_v10 }
 0x1a6   :  { %3182 = vmatprep.subr.bf16.mxu0 %v3573_v10  ;;  %3188 = vmatprep.subr.bf16.mxu1 %v3573_v10 }
 0x1ab   :  { %3173 = vmatmul.mubr.msk.bf16.vlgmr.msra.gmra.mrb[16].mxu0 %vm41_vm0, %v269_v32  ;;  %3179 = vmatmul.mubr.msk.bf16.vlgmr.msra.gmra.mrb[16].mxu1 %vm41_vm0, %v270_v33 }
 0x1ac   :  { %3183 = vmatpush3.bf16.msra.mxu0 %v753_v34  ;;  %3189 = vmatpush3.bf16.msra.mxu1 %v799_v35 }
 0x1ad   :  { %3184 = vmatprep.mubr.msk.bf16.mxu0 %vm3575_vm1, %v3573_v10  ;;  %3190 = vmatprep.mubr.msk.bf16.mxu1 %vm3575_vm1, %v3573_v10 }
 0x1ae   :  { %3194 = vmatprep.subr.bf16.mxu0 %v3573_v10  ;;  %3200 = vmatprep.subr.bf16.mxu1 %v3573_v10 }
 0x266   :  { %v341_v37 = vpop.f32.mrb[4].mxu0  ;;  %v384_v38 = vpop.f32.mrb[4].mxu1 }
 0x267   :  { %v342_v39 = vadd.f32 %v3779_v36, %v341_v37  ;;  %v385_v40 = vadd.f32 %v3779_v36, %v384_v38  ;;  %v3138_v41 = vpop.f32.mrb[5].mxu0  ;;  %v3144_v44 = vpop.f32.mrb[5].mxu1 }
 0x268   :  { %v344_v45 = vpop.f32.mrb[6].mxu0  ;;  %v387_v48 = vpop.f32.mrb[6].mxu1 }
 0x269   :  { %v3139_v51 = vpop.f32.mrb[7].mxu0  ;;  %v3145_v52 = vpop.f32.mrb[7].mxu1  ;;  %v655_v53 = vsel %vm651_vm3, %v385_v40, -inf  ;;  %v652_v54 = vsel %vm651_vm3, %v342_v39, -inf }
 0x26a   :  { %656 = vmax.xlane.f32.xlu1 %v655_v53  ;;  %653 = vmax.xlane.f32.xlu0 %v652_v54 }
 0x26e   :  { %v427_v55 = vpop.f32.mrb[8].mxu0  ;;  %v470_v56 = vpop.f32.mrb[8].mxu1 }
 0x26f   :  { %v428_v57 = vadd.f32 %v3779_v36, %v427_v55  ;;  %v471_v58 = vadd.f32 %v3779_v36, %v470_v56  ;;  %v3150_v59 = vpop.f32.mrb[9].mxu0  ;;  %v3156_v60 = vpop.f32.mrb[9].mxu1 }
 0x270   :  { %v430_v61 = vpop.f32.mrb[10].mxu0  ;;  %v473_v62 = vpop.f32.mrb[10].mxu1 }
 0x271   :  { %v3151_v63 = vpop.f32.mrb[11].mxu0  ;;  %v3157_v0 = vpop.f32.mrb[11].mxu1  ;;  %v661_v4 = vsel %vm651_vm3, %v471_v58, -inf  ;;  %v658_v5 = vsel %vm651_vm3, %v428_v57, -inf }
 0x272   :  { %662 = vmax.xlane.f32.xlu1 %v661_v4  ;;  %659 = vmax.xlane.f32.xlu0 %v658_v5 }
 0x276   :  { %v516_v7 = vpop.f32.mrb[12].mxu0  ;;  %v559_v8 = vpop.f32.mrb[12].mxu1 }
 0x277   :  { %v517_v12 = vadd.f32 %v3792_v6, %v516_v7  ;;  %v560_v14 = vadd.f32 %v3792_v6, %v559_v8  ;;  %v3162_v15 = vpop.f32.mrb[13].mxu0  ;;  %v3168_v16 = vpop.f32.mrb[13].mxu1 }
 0x278   :  { %v519_v17 = vpop.f32.mrb[14].mxu0  ;;  %v562_v18 = vpop.f32.mrb[14].mxu1 }
 0x279   :  { %v3163_v19 = vpop.f32.mrb[15].mxu0  ;;  %v3169_v20 = vpop.f32.mrb[15].mxu1  ;;  %v667_v21 = vsel %vm651_vm3, %v560_v14, -inf  ;;  %v664_v22 = vsel %vm651_vm3, %v517_v12, -inf }
 0x27a   :  { %668 = vmax.xlane.f32.xlu1 %v667_v21  ;;  %665 = vmax.xlane.f32.xlu0 %v664_v22 }
 0x27e   :  { %v602_v24 = vpop.f32.mrb[16].mxu0  ;;  %v645_v25 = vpop.f32.mrb[16].mxu1 }
 0x27f   :  { %v603_v26 = vadd.f32 %v3792_v6, %v602_v24  ;;  %v646_v27 = vadd.f32 %v3792_v6, %v645_v25  ;;  %v3174_v28 = vpop.f32.mrb[17].mxu0  ;;  %v3180_v29 = vpop.f32.mrb[17].mxu1 }
 0x280   :  { %v605_v30 = vpop.f32.mrb[18].mxu0  ;;  %v648_v31 = vpop.f32.mrb[18].mxu1 }
 0x281   :  { %v3175_v32 = vpop.f32.mrb[19].mxu0  ;;  %v3181_v33 = vpop.f32.mrb[19].mxu1  ;;  %v673_v34 = vsel %vm651_vm3, %v646_v27, -inf  ;;  %v670_v35 = vsel %vm651_vm3, %v603_v26, -inf  ;;  %v274_v31 = vmul.f32 %v3727_v11, %v3750_v23 }
 0x282   :  { %674 = vmax.xlane.f32.xlu1 %v673_v34  ;;  %671 = vmax.xlane.f32.xlu0 %v670_v35  ;;  %v273_v33 = vmul.f32 %v3722_v9, %v3750_v23 }
 0x2f7   :  { %v657_v37 = vpop.xlane.xlu1 %656  ;;  %v654_v38 = vpop.xlane.xlu0 %653 }
 0x2f8   :  { %v677_v41 = vsub.f32 %v385_v40, %v657_v37  ;;  %v676_v44 = vsub.f32 %v342_v39, %v654_v38  ;;  %v282_v38 = vpack.c.bf16 %v274_v31, %v274_v31 }
 0x2fa   :  { %v686_v45 = vmul.f32 1.442695, %v677_v41  ;;  %v684_v48 = vmul.f32 1.442695, %v676_v44  ;;  %v281_v44 = vpack.c.bf16 %v273_v33, %v273_v33 }
 0x2fc   :  { %3453 = vpow2.f32 %v686_v45  ;;  %v845_v23 = vsel %vm751_vm2, %v281_v44, 0 }
 0x2fd   :  { %3455 = vpow2.f32 %v684_v48 }
 0x2ff   :  { %v663_v51 = vpop.xlane.xlu1 %662  ;;  %v660_v52 = vpop.xlane.xlu0 %659 }
 0x300   :  { %v679_v53 = vsub.f32 %v471_v58, %v663_v51  ;;  %v678_v54 = vsub.f32 %v428_v57, %v660_v52  ;;  %v891_v51 = vsel %vm751_vm2, %v282_v38, 0 }
 0x302   :  { %v690_v55 = vmul.f32 1.442695, %v679_v53  ;;  %v688_v56 = vmul.f32 1.442695, %v678_v54  ;;  %v276_v53 = vmul.f32 %v3712_v3, %v3702_v1 }
 0x304   :  { %3457 = vpow2.f32 %v690_v55  ;;  %v275_v55 = vmul.f32 %v3707_v2, %v3702_v1 }
 0x305   :  { %3459 = vpow2.f32 %v688_v56 }
 0x306   :  { %v3454_v59 = vpop.eup %3453 }
 0x307   :  { %v3456_v60 = vpop.eup %3455  ;;  %v669_v61 = vpop.xlane.xlu1 %668  ;;  %v703_v63 = vsel %vm651_vm3, %v3454_v59, 0.0 }
 0x308   :  { %v666_v62 = vpop.xlane.xlu0 %665  ;;  %v681_v40 = vsub.f32 %v560_v14, %v669_v61  ;;  %704 = vadd.xlane.f32.xlu1 %v703_v63  ;;  %v700_v0 = vsel %vm651_vm3, %v3456_v60, 0.0  ;;  %v284_v61 = vpack.c.bf16 %v276_v53, %v276_v53  ;;  %v283_v63 = vpack.c.bf16 %v275_v55, %v275_v55 }
 0x309   :  { %v680_v39 = vsub.f32 %v517_v12, %v666_v62  ;;  %701 = vadd.xlane.f32.xlu0 %v700_v0 }
 0x30a   :  { %v694_v4 = vmul.f32 1.442695, %v681_v40  ;;  %v983_v0 = vsel %vm751_vm2, %v284_v61, 0 }
 0x30b   :  { %v692_v5 = vmul.f32 1.442695, %v680_v39 }
 0x30c   :  { %3461 = vpow2.f32 %v694_v4 }
 0x30d   :  { %3463 = vpow2.f32 %v692_v5  ;;  %v278_v5 = vmul.f32 %v3727_v11, %v3702_v1 }
 0x30e   :  { %v3458_v57 = vpop.eup %3457 }
 0x30f   :  { %v3804_v58 = vpop.eup %3459  ;;  %v675_v7 = vpop.xlane.xlu1 %674  ;;  %v709_v15 = vsel %vm651_vm3, %v3458_v57, 0.0 }
 0x310   :  { %v672_v8 = vpop.xlane.xlu0 %671  ;;  %v683_v16 = vsub.f32 %v646_v27, %v675_v7  ;;  %710 = vadd.xlane.f32.xlu1 %v709_v15  ;;  %v706_v12 = vsel %vm651_vm3, %v3804_v58, 0.0 }
 0x311   :  { %v682_v17 = vsub.f32 %v603_v26, %v672_v8  ;;  %707 = vadd.xlane.f32.xlu0 %v706_v12 }
 0x312   :  { %v698_v14 = vmul.f32 1.442695, %v683_v16  ;;  %v286_v16 = vpack.c.bf16 %v278_v5, %v278_v5 }
 0x313   :  { %v696_v18 = vmul.f32 1.442695, %v682_v17 }
 0x314   :  { %3465 = vpow2.f32 %v698_v14  ;;  %v1075_v14 = vsel %vm751_vm2, %v286_v16, 0 }
 0x315   :  { %3467 = vpow2.f32 %v696_v18 }
 0x316   :  { %v3809_v19 = vpop.eup %3461 }
 0x317   :  { %v3811_v20 = vpop.eup %3463  ;;  %v715_v21 = vsel %vm651_vm3, %v3809_v19, 0.0 }
 0x318   :  { %716 = vadd.xlane.f32.xlu1 %v715_v21  ;;  %v712_v22 = vsel %vm651_vm3, %v3811_v20, 0.0 }
 0x319   :  { %713 = vadd.xlane.f32.xlu0 %v712_v22 }
 0x31e   :  { %v3817_v24 = vpop.eup %3465 }
 0x31f   :  { %v3819_v25 = vpop.eup %3467  ;;  %v721_v26 = vsel %vm651_vm3, %v3817_v24, 0.0 }
 0x320   :  { %722 = vadd.xlane.f32.xlu1 %v721_v26  ;;  %v718_v27 = vsel %vm651_vm3, %v3819_v25, 0.0 }
 0x321   :  { %719 = vadd.xlane.f32.xlu0 %v718_v27 }
 0x395   :  { %v705_v28 = vpop.xlane.xlu1 %704 }
 0x396   :  { %3469 = vrcp.f32 %v705_v28  ;;  %v702_v29 = vpop.xlane.xlu0 %701 }
 0x397   :  { %3471 = vrcp.f32 %v702_v29 }
 0x39d   :  { %v711_v30 = vpop.xlane.xlu1 %710 }
 0x39e   :  { %3473 = vrcp.f32 %v711_v30  ;;  %v708_v32 = vpop.xlane.xlu0 %707 }
 0x39f   :  { %3475 = vrcp.f32 %v708_v32 }
 0x3a0   :  { %v3470_v34 = vpop.eup %3469 }
 0x3a1   :  { %v3472_v35 = vpop.eup %3471  ;;  %v733_v37 = vmul.f32 %v3470_v34, %v3454_v59 }
 0x3a2   :  { %v732_v41 = vmul.f32 %v3472_v35, %v3456_v60 }
 0x3a3   :  { %v741_v45 = vpack.c.bf16 %v733_v37, %v733_v37 }
 0x3a4   :  { %v740_v48 = vpack.c.bf16 %v732_v41, %v732_v41 }
 0x3a5   :  { %3191 = vmatmul.mubr.msk.bf16.vlgmr.msra.gmra.mrb[20].mxu1 %vm651_vm3, %v741_v45  ;;  %v717_v52 = vpop.xlane.xlu1 %716 }
 0x3a6   :  { %3201 = vmatpush3.bf16.msra.mxu1 %v891_v51  ;;  %3477 = vrcp.f32 %v717_v52  ;;  %3185 = vmatmul.mubr.msk.bf16.vlgmr.msra.gmra.mrb[20].mxu0 %vm651_vm3, %v740_v48  ;;  %v714_v54 = vpop.xlane.xlu0 %713 }
 0x3a7   :  { %3195 = vmatpush3.bf16.msra.mxu0 %v845_v23  ;;  %3479 = vrcp.f32 %v714_v54  ;;  %3196 = vmatprep.mubr.msk.bf16.mxu0 %vm3575_vm1, %v3573_v10 }
 0x3a8   :  { %v3474_v56 = vpop.eup %3473  ;;  %3202 = vmatprep.mubr.msk.bf16.mxu1 %vm3575_vm1, %v3573_v10  ;;  %3206 = vmatprep.subr.bf16.mxu0 %v3573_v10 }
 0x3a9   :  { %v3476_v59 = vpop.eup %3475  ;;  %v735_v60 = vmul.f32 %v3474_v56, %v3458_v57  ;;  %3212 = vmatprep.subr.bf16.mxu1 %v3573_v10  ;;  %v937_v57 = vsel %vm751_vm2, %v283_v63, 0 }
 0x3aa   :  { %v734_v62 = vmul.f32 %v3476_v59, %v3804_v58  ;;  %v277_v58 = vmul.f32 %v3722_v9, %v3702_v1 }
 0x3ab   :  { %v743_v40 = vpack.c.bf16 %v735_v60, %v735_v60 }
 0x3ac   :  { %v742_v39 = vpack.c.bf16 %v734_v62, %v734_v62  ;;  %v285_v1 = vpack.c.bf16 %v277_v58, %v277_v58 }
 0x3ad   :  { %3203 = vmatmul.mubr.msk.bf16.vlgmr.msra.gmra.mrb[24].mxu1 %vm651_vm3, %v743_v40  ;;  %v723_v4 = vpop.xlane.xlu1 %722 }
 0x3ae   :  { %3213 = vmatpush3.bf16.msra.mxu1 %v983_v0  ;;  %3481 = vrcp.f32 %v723_v4  ;;  %3197 = vmatmul.mubr.msk.bf16.vlgmr.msra.gmra.mrb[24].mxu0 %vm651_vm3, %v742_v39  ;;  %v720_v7 = vpop.xlane.xlu0 %719  ;;  %v1029_v18 = vsel %vm751_vm2, %v285_v1, 0 }
 0x3af   :  { %3207 = vmatpush3.bf16.msra.mxu0 %v937_v57  ;;  %3483 = vrcp.f32 %v720_v7  ;;  %3208 = vmatprep.mubr.msk.bf16.mxu0 %vm3575_vm1, %v3573_v10 }
 0x3b0   :  { %v3478_v8 = vpop.eup %3477  ;;  %3214 = vmatprep.mubr.msk.bf16.mxu1 %vm3575_vm1, %v3573_v10  ;;  %3218 = vmatprep.subr.bf16.mxu0 %v3573_v10 }
 0x3b1   :  { %v3480_v11 = vpop.eup %3479  ;;  %v737_v15 = vmul.f32 %v3478_v8, %v3809_v19  ;;  %3224 = vmatprep.subr.bf16.mxu1 %v3573_v10 }
 0x3b2   :  { %v736_v17 = vmul.f32 %v3480_v11, %v3811_v20 }
 0x3b3   :  { %v745_v9 = vpack.c.bf16 %v737_v15, %v737_v15 }
 0x3b4   :  { %v744_v12 = vpack.c.bf16 %v736_v17, %v736_v17 }
 0x3b5   :  { %3215 = vmatmul.mubr.msk.bf16.vlgmr.msra.gmra.mrb[28].mxu1 %vm651_vm3, %v745_v9 }
 0x3b6   :  { %3209 = vmatmul.mubr.msk.bf16.vlgmr.msra.gmra.mrb[28].mxu0 %vm651_vm3, %v744_v12  ;;  %3225 = vmatpush3.bf16.msra.mxu1 %v1075_v14 }
 0x3b7   :  { %3219 = vmatpush3.bf16.msra.mxu0 %v1029_v18  ;;  %3220 = vmatprep.mubr.msk.bf16.mxu0 %vm3575_vm1, %v3573_v10 }
 0x3b8   :  { %v3482_v19 = vpop.eup %3481  ;;  %3226 = vmatprep.mubr.msk.bf16.mxu1 %vm3575_vm1, %v3573_v10  ;;  %3230 = vmatprep.subr.bf16.mxu0 %v3573_v10 }
 0x3b9   :  { %v3484_v20 = vpop.eup %3483  ;;  %v739_v21 = vmul.f32 %v3482_v19, %v3817_v24  ;;  %3238 = vmatprep.subr.bf16.mxu1 %v3573_v10  ;;  %v3421_v24 = vld [vmem:[%s4285_s4] sm:$0xff]  }
 0x3ba   :  { %v738_v22 = vmul.f32 %v3484_v20, %v3819_v25  ;;  %v3422_v25 = vld [vmem:[%s4285_s4 + $0x8] sm:$0xff]  }
 0x3bb   :  { %v747_v26 = vpack.c.bf16 %v739_v21, %v739_v21 }
 0x3bc   :  { %v746_v27 = vpack.c.bf16 %v738_v22, %v738_v22  ;;  %v1131_v22 = vld [vmem:[%s4290_s9 + $0x3] ss:$0 sm:$0xff] }
 0x3bd   :  { %3227 = vmatmul.mubr.msk.bf16.vlgmr.msra.gmra.mrb[32].mxu1 %vm651_vm3, %v747_v26 }
 0x3be   :  { %3221 = vmatmul.mubr.msk.bf16.vlgmr.msra.gmra.mrb[32].mxu0 %vm651_vm3, %v746_v27  ;;  %3242 = vmatprep.mubr.msk.bf16.mxu1 %vm3575_vm1, %v3573_v10 }
 0x3bf   :  { %3234 = vmatprep.mubr.msk.bf16.mxu0 %vm3575_vm1, %v3573_v10  ;;  %3231 = vmatpush3.bf16.msra.mxu0 %v3421_v24 }
 0x3c0   :  { %3232 = vmatprep.subr.bf16.mxu0 %v3573_v10 }
 0x3c3   :  { %3233 = vmatpush3.bf16.msra.mxu0 %v3422_v25 }
 0x3c4   :  { %3246 = vmatprep.subr.bf16.mxu0 %v3573_v10 }
 0x478   :  { %v835_v28 = vpop.f32.mrb[20].mxu1 }
 0x479   :  { %v789_v29 = vpop.f32.mrb[20].mxu0  ;;  %v1118_v30 = vsel %vm41_vm0, %v835_v28, 0.0  ;;  %v3192_v31 = vpop.f32.mrb[21].mxu1 }
 0x47a   :  { %v1117_v32 = vsel %vm41_vm0, %v789_v29, 0.0  ;;  %v3186_v33 = vpop.f32.mrb[21].mxu0  ;;  %v838_v34 = vpop.f32.mrb[22].mxu1 }
 0x47b   :  { %v1119_v35 = vadd.f32 %v1118_v30, %v1117_v32  ;;  %v792_v37 = vpop.f32.mrb[22].mxu0  ;;  %v3193_v38 = vpop.f32.mrb[23].mxu1 }
 0x47c   :  { %v3187_v41 = vpop.f32.mrb[23].mxu0 }
 0x480   :  { %v927_v44 = vpop.f32.mrb[24].mxu1 }
 0x481   :  { %v881_v45 = vpop.f32.mrb[24].mxu0  ;;  %v3204_v48 = vpop.f32.mrb[25].mxu1  ;;  %v1122_v56 = vsel %vm41_vm0, %v927_v44, 0.0 }
 0x482   :  { %v1120_v51 = vsel %vm41_vm0, %v881_v45, 0.0  ;;  %v3198_v52 = vpop.f32.mrb[25].mxu0  ;;  %v930_v53 = vpop.f32.mrb[26].mxu1 }
 0x483   :  { %v1121_v23 = vadd.f32 %v1120_v51, %v1119_v35  ;;  %v884_v54 = vpop.f32.mrb[26].mxu0  ;;  %v3205_v55 = vpop.f32.mrb[27].mxu1 }
 0x484   :  { %v3199_v59 = vpop.f32.mrb[27].mxu0 }
 0x485   :  { %v1123_v60 = vadd.f32 %v1122_v56, %v1121_v23 }
 0x488   :  { %v1019_v61 = vpop.f32.mrb[28].mxu1 }
 0x489   :  { %v973_v62 = vpop.f32.mrb[28].mxu0  ;;  %v1125_v63 = vsel %vm41_vm0, %v1019_v61, 0.0  ;;  %v3216_v40 = vpop.f32.mrb[29].mxu1 }
 0x48a   :  { %v1124_v39 = vsel %vm41_vm0, %v973_v62, 0.0  ;;  %v3210_v0 = vpop.f32.mrb[29].mxu0  ;;  %v1022_v4 = vpop.f32.mrb[30].mxu1 }
 0x48b   :  { %v1126_v5 = vadd.f32 %v1125_v63, %v1124_v39  ;;  %v976_v57 = vpop.f32.mrb[30].mxu0  ;;  %v3217_v7 = vpop.f32.mrb[31].mxu1  ;;  %v1193_v0 = vld [vmem:[%s4290_s9 + $0x4] ss:$0 sm:$0xff] }
 0x48c   :  { %v3211_v58 = vpop.f32.mrb[31].mxu0 }
 0x490   :  { %v1111_v8 = vpop.f32.mrb[32].mxu1 }
 0x491   :  { %v1065_v11 = vpop.f32.mrb[32].mxu0  ;;  %v3228_v15 = vpop.f32.mrb[33].mxu1  ;;  %v1129_v18 = vsel %vm41_vm0, %v1111_v8, 0.0  ;;  %v1194_v8 = vld [vmem:[%s4290_s9 + $0x5] ss:$0 sm:$0xff] }
 0x492   :  { %v1127_v16 = vsel %vm41_vm0, %v1065_v11, 0.0  ;;  %v3222_v17 = vpop.f32.mrb[33].mxu0  ;;  %v1114_v1 = vpop.f32.mrb[34].mxu1 }
 0x493   :  { %v1128_v9 = vadd.f32 %v1127_v16, %v1126_v5  ;;  %v1068_v12 = vpop.f32.mrb[34].mxu0  ;;  %v3229_v14 = vpop.f32.mrb[35].mxu1  ;;  %v3425_v1 = vld [vmem:[%s4287_s6] sm:$0xff]  }
 0x494   :  { %v3223_v19 = vpop.f32.mrb[35].mxu0  ;;  %v3427_v12 = vld [vmem:[%s4287_s6 + $0x10] sm:$0xff]   ;;  %v1233_v14 = vld [vmem:[%s4290_s9 + $0x6] ss:$0 sm:$0xff] }
 0x495   :  { %v1130_v20 = vadd.f32 %v1129_v18, %v1128_v9  ;;  %v3426_v9 = vld [vmem:[%s4287_s6 + $0x8] sm:$0xff]  }
 0x497   :  { %v1132_v21 = vpack.c.bf16 %v1130_v20, %v1123_v60 }
 0x499   :  { %3235 = vmatmul.mubr.msk.bf16.vlgmr.msra.gmra.mrb[36].mxu0 %vm41_vm0, %v1132_v21 }
 0x49a   :  { %3254 = vmatprep.mubr.msk.bf16.mxu0 %vm3575_vm1, %v3573_v10  ;;  %3247 = vmatpush3.bf16.msra.mxu0 %v3425_v1 }
 0x49b   :  { %3248 = vmatprep.subr.bf16.mxu0 %v3573_v10 }
 0x49e   :  { %3249 = vmatpush3.bf16.msra.mxu0 %v3426_v9 }
 0x49f   :  { %3250 = vmatprep.subr.bf16.mxu0 %v3573_v10 }
 0x4a2   :  { %3251 = vmatpush3.bf16.msra.mxu0 %v3427_v12 }
 0x4a3   :  { %3252 = vmatprep.subr.bf16.mxu0 %v3573_v10 }
 0x56c   :  { %v1186_v26 = vpop.f32.mrb[36].mxu0 }
 0x56d   :  { %v1187_v27 = vadd.f32 %v1186_v26, %v1131_v22  ;;  %v3236_v24 = vpop.f32.mrb[37].mxu0 }
 0x56e   :  { %v1189_v25 = vpop.f32.mrb[38].mxu0 }
 0x56f   :  { %v1195_v28 = vadd.f32 %v1187_v27, %v3676_v42  ;;  %v1190_v29 = vadd.f32 %v1189_v25, %v1131_v22  ;;  %v3237_v30 = vpop.f32.mrb[39].mxu0  ;;  %v3423_v42 = vld [vmem:[%s4286_s5] sm:$0xff]  }
 0x570   :  { %3239 = vmatpush3.bf16.msra.mxu1 %v3423_v42 }
 0x571   :  { %v1196_v31 = vadd.f32 %v1190_v29, %v3678_v43  ;;  %v1197_v32 = vsel %vm41_vm0, %v1195_v28, 0.0  ;;  %v1205_v33 = vmul.f32 %v1195_v28, %v1195_v28  ;;  %v3424_v43 = vld [vmem:[%s4286_s5 + $0x8] sm:$0xff]   ;;  %3240 = vmatprep.subr.bf16.mxu1 %v3573_v10 }
 0x572   :  { %1198 = vadd.xlane.f32.xlu0 %v1197_v32 }
 0x573   :  { %v1200_v34 = vsel %vm41_vm0, %v1196_v31, 0.0  ;;  %v1206_v35 = vmul.f32 %v1196_v31, %v1196_v31  ;;  %v1207_v37 = vsel %vm41_vm0, %v1205_v33, 0.0 }
 0x574   :  { %1201 = vadd.xlane.f32.xlu1 %v1200_v34  ;;  %3241 = vmatpush3.bf16.msra.mxu1 %v3424_v43 }
 0x575   :  { %v1210_v38 = vsel %vm41_vm0, %v1206_v35, 0.0 }
 0x576   :  { %1208 = vadd.xlane.f32.xlu0 %v1207_v37 }
 0x578   :  { %1211 = vadd.xlane.f32.xlu1 %v1210_v38 }
 0x5ff   :  { %v1199_v41 = vpop.xlane.xlu0 %1198 }
 0x600   :  { %v1203_v44 = vmul.f32 0.03125, %v1199_v41 }
 0x601   :  { %v1202_v45 = vpop.xlane.xlu1 %1201 }
 0x602   :  { %v1204_v48 = vmul.f32 0.03125, %v1202_v45  ;;  %v1215_v52 = vmul.f32 %v1203_v44, %v1203_v44  ;;  %v1221_v40 = vsub.f32 %v1195_v28, %v1203_v44 }
 0x603   :  { %v1209_v51 = vpop.xlane.xlu0 %1208 }
 0x604   :  { %v1213_v53 = vmul.f32 0.03125, %v1209_v51  ;;  %v1216_v54 = vmul.f32 %v1204_v48, %v1204_v48  ;;  %v1222_v4 = vsub.f32 %v1196_v31, %v1204_v48  ;;  %v1313_v51 = vld [vmem:[%s4290_s9 + $0x7] ss:$0 sm:$0xff] }
 0x605   :  { %v1212_v23 = vpop.xlane.xlu1 %1211 }
 0x606   :  { %v1217_v55 = vsub.f32 %v1213_v53, %v1215_v52  ;;  %v1214_v56 = vmul.f32 0.03125, %v1212_v23 }
 0x608   :  { %v1219_v59 = vmax.f32 %v1217_v55, 0.0  ;;  %v1218_v60 = vsub.f32 %v1214_v56, %v1216_v54 }
 0x60a   :  { %v1223_v61 = vadd.f32 1e-12, %v1219_v59  ;;  %v1220_v62 = vmax.f32 %v1218_v60, 0.0 }
 0x60c   :  { %3485 = vrsqrt.f32 %v1223_v61  ;;  %v1224_v63 = vadd.f32 1e-12, %v1220_v62 }
 0x60e   :  { %3487 = vrsqrt.f32 %v1224_v63 }
 0x616   :  { %v3486_v39 = vpop.eup %3485 }
 0x617   :  { %v1227_v5 = vmul.f32 %v3486_v39, %v1221_v40 }
 0x618   :  { %v3488_v57 = vpop.eup %3487 }
 0x619   :  { %v1228_v7 = vmul.f32 %v3488_v57, %v1222_v4  ;;  %v1229_v58 = vmul.f32 %v1227_v5, %v1193_v0  ;;  %v3429_v4 = vld [vmem:[%s4284_s3 + $0x30] ss:$12 sps:$4 sm:$0xff]   ;;  %v3431_v5 = vld [vmem:[%s4284_s3 + $0x34] ss:$12 sps:$4 sm:$0xff]   ;;  %v3434_v57 = vld [vmem:[%s4284_s3 + $0x4c] ss:$12 sps:$4 sm:$0xff]  }
 0x61a   :  { %1495 = vmatprep.subr.bf16.mxu1 %v3431_v5 }
 0x61b   :  { %v1230_v11 = vmul.f32 %v1228_v7, %v1193_v0  ;;  %v1231_v15 = vadd.f32 %v1229_v58, %v1194_v8  ;;  %v3432_v7 = vld [vmem:[%s4284_s3 + $0x48] ss:$12 sps:$4 sm:$0xff]  }
 0x61d   :  { %v1232_v16 = vadd.f32 %v1230_v11, %v1194_v8 }
 0x61f   :  { %v1234_v17 = vpack.c.bf16 %v1232_v16, %v1231_v15 }
 0x621   :  { %3243 = vmatmul.mubr.msk.bf16.vlgmr.msra.gmra.mrb[36].mxu1 %vm41_vm0, %v1234_v17 }
 0x622   :  { %1527 = vmatprep.mubr.bf16.mxu1 %v3574_v13  ;;  %v3428_v13 = vld [vmem:[%s4287_s6 + $0x18] sm:$0xff]   ;;  %1496 = vmatpush1.bf16.msra.mxu1 %v3429_v4 }
 0x623   :  { %3253 = vmatpush3.bf16.msra.mxu0 %v3428_v13  ;;  %1497 = vmatprep.subr.bf16.mxu1 %v3434_v57 }
 0x624   :  { %3266 = vmatprep.subr.bf16.mxu0 %v3573_v10 }
 0x626   :  { %1498 = vmatpush1.bf16.msra.mxu1 %v3432_v7 }
 0x627   :  { %3258 = vmatprep.subr.bf16.mxu1 %v3573_v10 }
 0x6f4   :  { %v1288_v18 = vpop.f32.mrb[36].mxu1 }
 0x6f5   :  { %v1289_v19 = vadd.f32 %v1288_v18, %v1233_v14  ;;  %v3244_v20 = vpop.f32.mrb[37].mxu1 }
 0x6f6   :  { %v1291_v21 = vpop.f32.mrb[38].mxu1 }
 0x6f7   :  { %v1297_v22 = vmul.f32 0.044715, %v1289_v19  ;;  %v1292_v26 = vadd.f32 %v1291_v21, %v1233_v14  ;;  %v3245_v27 = vpop.f32.mrb[39].mxu1  ;;  %v1295_v42 = vmul.f32 0.5, %v1289_v19 }
 0x6f9   :  { %v1299_v24 = vmul.f32 %v1297_v22, %v1289_v19  ;;  %v1298_v25 = vmul.f32 0.044715, %v1292_v26  ;;  %v1296_v43 = vmul.f32 0.5, %v1292_v26 }
 0x6fb   :  { %v1301_v28 = vmul.f32 %v1299_v24, %v1289_v19  ;;  %v1300_v29 = vmul.f32 %v1298_v25, %v1292_v26  ;;  %v1392_v24 = vld [vmem:[%s4290_s9 + $0x18] ss:$0 sm:$0xff] }
 0x6fd   :  { %v1303_v30 = vadd.f32 %v1301_v28, %v1289_v19  ;;  %v1302_v31 = vmul.f32 %v1300_v29, %v1292_v26 }
 0x6ff   :  { %v1305_v32 = vmul.f32 0.7978846, %v1303_v30  ;;  %v1304_v33 = vadd.f32 %v1302_v31, %v1292_v26 }
 0x701   :  { %3489 = vtanh.f32 %v1305_v32  ;;  %v1306_v34 = vmul.f32 0.7978846, %v1304_v33  ;;  %v1393_v32 = vld [vmem:[%s4290_s9 + $0x19] ss:$0 sm:$0xff] }
 0x703   :  { %3491 = vtanh.f32 %v1306_v34 }
 0x70b   :  { %v3490_v35 = vpop.eup %3489 }
 0x70c   :  { %v1309_v37 = vadd.f32 1.0, %v3490_v35 }
 0x70d   :  { %v3492_v38 = vpop.eup %3491 }
 0x70e   :  { %v1310_v41 = vadd.f32 1.0, %v3492_v38  ;;  %v1311_v44 = vmul.f32 %v1309_v37, %v1295_v42  ;;  %v3435_v37 = vld [vmem:[%s4284_s3 + $0x38] ss:$12 sps:$4 sm:$0xff]   ;;  %v3436_v42 = vld [vmem:[%s4284_s3 + $0x50] ss:$12 sps:$4 sm:$0xff]   ;;  %s2909_s3 = sshll.u32 %s3577_s26, 4  ;;  %s2910_s3 = int_to_ptr.vmem [resolvable:$true] %s2909_s3 }
 0x70f   :  { %s3549_s27 = scalar_lea.vmem %s2910_s3, 32  ;;  %p3554_p1 = scmp.lt.s32.totalorder %s2910_s3, %s2910_s3 }
 0x710   :  { %v1312_v45 = vmul.f32 %v1310_v41, %v1296_v43  ;;  %v2962_v43 = vld [vmem:[%s4290_s9 + $0x1a] ss:$8 sm:$0x7]  ;;  %p3550_p0 = scmp.ne.s32.totalorder %s2910_s3, %s3549_s27  ;;  %p3555_p2 = scmp.lt.s32.totalorder %s3549_s27, %s3549_s27 }
 0x711   :  { %v1452_v41 = vrot.slane %v2962_v43, %v103_v47  ;;  %v1456_v47 = vrot.slane %v2962_v43, %v107_v50 }
 0x712   :  { %v1314_v48 = vpack.c.bf16 %v1312_v45, %v1311_v44  ;;  %v1448_v44 = vrot.slane %v2962_v43, %v99_v49  ;;  %p3556_p3 = por %p3555_p2, %p3554_p1 }
 0x714   :  { %3255 = vmatmul.mubr.msk.bf16.vlgmr.msra.gmra.mrb[40].mxu0 %vm1347_vm4, %v1314_v48  ;;  %p3557_p4 = pnand %p3556_p3, %p3550_p0 }
 0x715   :  { %3268 = vmatprep.mubr.msk.bf16.mxu0 %vm3575_vm1, %v3573_v10 }
 0x7e7   :  { %v1385_v52 = vpop.f32.mrb[40].mxu0 }
 0x7e8   :  { %v1386_v53 = vadd.f32 %v1385_v52, %v1313_v51  ;;  %v3256_v23 = vpop.f32.mrb[41].mxu0 }
 0x7e9   :  { %v1388_v54 = vpop.f32.mrb[42].mxu0 }
 0x7ea   :  { %v1394_v55 = vadd.f32 %v1386_v53, %v1231_v15  ;;  %v1389_v56 = vadd.f32 %v1388_v54, %v1313_v51  ;;  %v3257_v59 = vpop.f32.mrb[43].mxu0 }
 0x7ec   :  { %v1395_v60 = vadd.f32 %v1389_v56, %v1232_v16  ;;  %v1396_v61 = vsel %vm41_vm0, %v1394_v55, 0.0  ;;  %v1404_v62 = vmul.f32 %v1394_v55, %v1394_v55 }
 0x7ed   :  { %1397 = vadd.xlane.f32.xlu0 %v1396_v61 }
 0x7ee   :  { %v1399_v63 = vsel %vm41_vm0, %v1395_v60, 0.0  ;;  %v1405_v40 = vmul.f32 %v1395_v60, %v1395_v60  ;;  %v1406_v39 = vsel %vm41_vm0, %v1404_v62, 0.0 }
 0x7ef   :  { %1400 = vadd.xlane.f32.xlu1 %v1399_v63 }
 0x7f0   :  { %v1409_v0 = vsel %vm41_vm0, %v1405_v40, 0.0 }
 0x7f1   :  { %1407 = vadd.xlane.f32.xlu0 %v1406_v39 }
 0x7f3   :  { %1410 = vadd.xlane.f32.xlu1 %v1409_v0 }
 0x87a   :  { %v1398_v58 = vpop.xlane.xlu0 %1397 }
 0x87b   :  { %v1402_v8 = vmul.f32 0.03125, %v1398_v58 }
 0x87c   :  { %v1401_v11 = vpop.xlane.xlu1 %1400 }
 0x87d   :  { %v1403_v15 = vmul.f32 0.03125, %v1401_v11  ;;  %v1414_v17 = vmul.f32 %v1402_v8, %v1402_v8  ;;  %v1420_v26 = vsub.f32 %v1394_v55, %v1402_v8  ;;  %v4031_v11 = vld [vmem:[%s4283_s2] ss:$0 sm:$0xff] }
 0x87e   :  { %v1408_v16 = vpop.xlane.xlu0 %1407 }
 0x87f   :  { %v1412_v1 = vmul.f32 0.03125, %v1408_v16  ;;  %v1415_v12 = vmul.f32 %v1403_v15, %v1403_v15  ;;  %v1421_v25 = vsub.f32 %v1395_v60, %v1403_v15  ;;  %v4037_v16 = vld [vmem:[%s4283_s2 + $0x1] ss:$0 sm:$0xff] }
 0x880   :  { %v1411_v9 = vpop.xlane.xlu1 %1410 }
 0x881   :  { %v1416_v13 = vsub.f32 %v1412_v1, %v1414_v17  ;;  %v1413_v14 = vmul.f32 0.03125, %v1411_v9 }
 0x883   :  { %v1418_v18 = vmax.f32 %v1416_v13, 0.0  ;;  %v1417_v19 = vsub.f32 %v1413_v14, %v1415_v12 }
 0x885   :  { %v1422_v20 = vadd.f32 1e-12, %v1418_v18  ;;  %v1419_v21 = vmax.f32 %v1417_v19, 0.0 }
 0x887   :  { %3493 = vrsqrt.f32 %v1422_v20  ;;  %v1423_v22 = vadd.f32 1e-12, %v1419_v21 }
 0x889   :  { %3495 = vrsqrt.f32 %v1423_v22 }
 0x891   :  { %v3494_v27 = vpop.eup %3493 }
 0x892   :  { %v1426_v28 = vmul.f32 %v3494_v27, %v1420_v26 }
 0x893   :  { %v3496_v29 = vpop.eup %3495 }
 0x894   :  { %v1427_v30 = vmul.f32 %v3496_v29, %v1421_v25  ;;  %v1428_v31 = vmul.f32 %v1426_v28, %v1392_v24 }
 0x896   :  { %v1429_v33 = vmul.f32 %v1427_v30, %v1392_v24  ;;  %v3969_v34 = vadd.f32 %v1428_v31, %v1393_v32 }
 0x898   :  { %v3971_v35 = vadd.f32 %v1429_v33, %v1393_v32 }
 0x89a   :  { %v1434_v38 = vpack.c.bf16 %v3971_v35, %v3969_v34 }
 0x89c   :  { %2977 = vmatmul.mubr.msk.bf16.vlgmr.msra.gmra.mrb[40].mxu1 %vm41_vm0, %v1434_v38 }
 0x89d   :  { %3259 = vmatpush3.bf16.msra.mxu1 %v3435_v37  ;;  %3262 = vmatprep.mubr.msk.bf16.mxu1 %vm3575_vm1, %v3573_v10 }
 0x89e   :  { %3260 = vmatprep.subr.bf16.mxu1 %v3573_v10 }
 0x8a1   :  { %3261 = vmatpush3.bf16.msra.mxu1 %v3436_v42 }
 0x8a2   :  { %3272 = vmatprep.subr.bf16.mxu1 %v3573_v10 }
 0x8a4   :  { %3263 = vmatmul.mubr.msk.bf16.vlgmr.msra.gmra.mrb[44].mxu1 %vm41_vm0, %v1434_v38 }
 0x8a5   :  { %3274 = vmatprep.mubr.msk.bf16.mxu1 %vm3575_vm1, %v3573_v10 }
 0x96f   :  { %v1529_v45 = vpop.f32.mrb[40].mxu1 }
 0x970   :  { %v1531_v48 = vpop.f32.mrb[41].mxu1  ;;  %v1530_v23 = vadd.f32 %v1529_v45, %v1448_v44 }
 0x971   :  { %v1532_v51 = vadd.f32 %v1531_v48, %v1452_v41  ;;  %v1533_v52 = vpop.f32.mrb[42].mxu1  ;;  %v3547_v48 = vld [vmem:[%s4282_s1] ss:$0 sm:$0xff] }
 0x972   :  { %v1535_v53 = vpop.f32.mrb[43].mxu1  ;;  %v1579_v56 = vmul.f32 %v3707_v2, %v1530_v23  ;;  %v1580_v59 = vmul.f32 %v3712_v3, %v1530_v23  ;;  %v4010_v2 = vld [vmem:[%s4283_s2 + $0x2] ss:$0 sm:$0xff]  ;;  %v4016_v3 = vld [vmem:[%s4283_s2 + $0x3] ss:$0 sm:$0xff]  ;;  %v1534_v58 = vadd.f32 %v1533_v52, %v1448_v44 }
 0x973   :  { %v1611_v54 = vpack.c.bf16 %v1532_v51, %v1532_v51  ;;  %v1536_v0 = vadd.f32 %v1535_v53, %v1452_v41  ;;  %v1581_v50 = vmul.f32 %v4010_v2, %v1530_v23  ;;  %v1582_v4 = vmul.f32 %v4016_v3, %v1530_v23 }
 0x974   :  { %v1587_v40 = vpack.c.bf16 %v1579_v56, %v1579_v56  ;;  %v1588_v39 = vpack.c.bf16 %v1580_v59, %v1580_v59  ;;  %v1583_v15 = vmul.f32 %v4031_v11, %v1534_v58  ;;  %v1584_v17 = vmul.f32 %v4037_v16, %v1534_v58 }
 0x975   :  { %v1617_v55 = vsel %vm41_vm0, %v1611_v54, 0  ;;  %v1612_v5 = vpack.c.bf16 %v1536_v0, %v1536_v0  ;;  %v1589_v57 = vpack.c.bf16 %v1581_v50, %v1581_v50  ;;  %v1590_v7 = vpack.c.bf16 %v1582_v4, %v1582_v4 }
 0x976   :  { %3267 = vmatpush3.bf16.xpose.msra.mxu0 %v1617_v55  ;;  %3273 = vmatpush3.bf16.xpose.msra.mxu1 %v1617_v55  ;;  %v1591_v9 = vpack.c.bf16 %v1583_v15, %v1583_v15  ;;  %v1592_v12 = vpack.c.bf16 %v1584_v17, %v1584_v17  ;;  %v1585_v18 = vmul.f32 %v4010_v2, %v1534_v58  ;;  %v3548_v15 = vld [vmem:[%s4282_s1 + $0x1] ss:$0 sm:$0xff] }
 0x977   :  { %v1572_v60 = vpop.f32.mrb[44].mxu1  ;;  %3278 = vmatprep.subr.bf16.mxu0 %v3573_v10  ;;  %3284 = vmatprep.subr.bf16.mxu1 %v3573_v10  ;;  %v1792_v8 = vsel %vm41_vm0, %v1612_v5, 0  ;;  %v1586_v19 = vmul.f32 %v4016_v3, %v1534_v58 }
 0x978   :  { %v3264_v49 = vpop.f32.mrb[45].mxu1  ;;  %v4046_v1 = vadd.f32 %v1572_v60, %v1456_v47  ;;  %v1593_v22 = vpack.c.bf16 %v1585_v18, %v1585_v18 }
 0x979   :  { %v1575_v61 = vpop.f32.mrb[46].mxu1  ;;  %v1594_v26 = vpack.c.bf16 %v1586_v19, %v1586_v19 }
 0x97a   :  { %v4003_v62 = vadd.f32 %v1575_v61, %v1456_v47  ;;  %v3265_v63 = vpop.f32.mrb[47].mxu1  ;;  %v1595_v13 = vmul.f32 %v4031_v11, %v4046_v1  ;;  %v1596_v14 = vmul.f32 %v4037_v16, %v4046_v1 }
 0x97c   :  { %v1603_v20 = vpack.c.bf16 %v1595_v13, %v1595_v13  ;;  %v1604_v21 = vpack.c.bf16 %v1596_v14, %v1596_v14 }
 0x97d   :  { %3269 = vmatmul.mubr.msk.bf16.vlgmr.msra.gmra.mrb[44].mxu0 %vm41_vm0, %v1587_v40  ;;  %3275 = vmatmul.mubr.msk.bf16.vlgmr.msra.gmra.mrb[48].mxu1 %vm41_vm0, %v1588_v39 }
 0x97e   :  { %3279 = vmatpush3.bf16.xpose.msra.mxu0 %v1617_v55  ;;  %3285 = vmatpush3.bf16.xpose.msra.mxu1 %v1617_v55  ;;  %v2063_v27 = vsel %vm751_vm2, %v1603_v20, 0  ;;  %v2109_v24 = vsel %vm751_vm2, %v1604_v21, 0 }
 0x97f   :  { %3280 = vmatprep.mubr.msk.bf16.mxu0 %vm3575_vm1, %v3573_v10  ;;  %3286 = vmatprep.mubr.msk.bf16.mxu1 %vm3575_vm1, %v3573_v10 }
 0x980   :  { %3290 = vmatprep.subr.bf16.mxu0 %v3573_v10  ;;  %3296 = vmatprep.subr.bf16.mxu1 %v3573_v10 }
 0x985   :  { %3281 = vmatmul.mubr.msk.bf16.vlgmr.msra.gmra.mrb[48].mxu0 %vm41_vm0, %v1589_v57  ;;  %3287 = vmatmul.mubr.msk.bf16.vlgmr.msra.gmra.mrb[52].mxu1 %vm41_vm0, %v1590_v7 }
 0x986   :  { %3291 = vmatpush3.bf16.xpose.msra.mxu0 %v1792_v8  ;;  %3297 = vmatpush3.bf16.xpose.msra.mxu1 %v1792_v8 }
 0x987   :  { %3292 = vmatprep.mubr.msk.bf16.mxu0 %vm3575_vm1, %v3573_v10  ;;  %3298 = vmatprep.mubr.msk.bf16.mxu1 %vm3575_vm1, %v3573_v10 }
 0x988   :  { %3302 = vmatprep.subr.bf16.mxu0 %v3573_v10  ;;  %3308 = vmatprep.subr.bf16.mxu1 %v3573_v10 }
 0x98d   :  { %3293 = vmatmul.mubr.msk.bf16.vlgmr.msra.gmra.mrb[52].mxu0 %vm41_vm0, %v1591_v9  ;;  %3299 = vmatmul.mubr.msk.bf16.vlgmr.msra.gmra.mrb[56].mxu1 %vm41_vm0, %v1592_v12 }
 0x98e   :  { %3303 = vmatpush3.bf16.xpose.msra.mxu0 %v1792_v8  ;;  %3309 = vmatpush3.bf16.xpose.msra.mxu1 %v1792_v8 }
 0x98f   :  { %3304 = vmatprep.mubr.msk.bf16.mxu0 %vm3575_vm1, %v3573_v10  ;;  %3310 = vmatprep.mubr.msk.bf16.mxu1 %vm3575_vm1, %v3573_v10 }
 0x990   :  { %3314 = vmatprep.subr.bf16.mxu0 %v3573_v10  ;;  %3320 = vmatprep.subr.bf16.mxu1 %v3573_v10 }
 0x995   :  { %3305 = vmatmul.mubr.msk.bf16.vlgmr.msra.gmra.mrb[56].mxu0 %vm41_vm0, %v1593_v22  ;;  %3311 = vmatmul.mubr.msk.bf16.vlgmr.msra.gmra.mrb[60].mxu1 %vm41_vm0, %v1594_v26 }
 0x996   :  { %3315 = vmatpush3.bf16.msra.mxu0 %v2063_v27  ;;  %3321 = vmatpush3.bf16.msra.mxu1 %v2109_v24 }
 0x997   :  { %3316 = vmatprep.mubr.msk.bf16.mxu0 %vm3575_vm1, %v3573_v10  ;;  %3322 = vmatprep.mubr.msk.bf16.mxu1 %vm3575_vm1, %v3573_v10 }
 0x998   :  { %3326 = vmatprep.subr.bf16.mxu0 %v3573_v10  ;;  %3332 = vmatprep.subr.bf16.mxu1 %v3573_v10 }
 0xa50   :  { %v1653_v25 = vpop.f32.mrb[44].mxu0  ;;  %v1696_v28 = vpop.f32.mrb[48].mxu1 }
 0xa51   :  { %v1654_v29 = vadd.f32 %v3779_v36, %v1653_v25  ;;  %v1697_v30 = vadd.f32 %v3779_v36, %v1696_v28  ;;  %v3270_v31 = vpop.f32.mrb[45].mxu0  ;;  %v3276_v32 = vpop.f32.mrb[49].mxu1 }
 0xa52   :  { %v1656_v33 = vpop.f32.mrb[46].mxu0  ;;  %v1699_v37 = vpop.f32.mrb[50].mxu1 }
 0xa53   :  { %v3271_v38 = vpop.f32.mrb[47].mxu0  ;;  %v3277_v42 = vpop.f32.mrb[51].mxu1  ;;  %v1966_v43 = vsel %vm651_vm3, %v1697_v30, -inf  ;;  %v1963_v41 = vsel %vm651_vm3, %v1654_v29, -inf }
 0xa54   :  { %1967 = vmax.xlane.f32.xlu1 %v1966_v43  ;;  %1964 = vmax.xlane.f32.xlu0 %v1963_v41 }
 0xa58   :  { %v1739_v44 = vpop.f32.mrb[48].mxu0  ;;  %v1782_v45 = vpop.f32.mrb[52].mxu1 }
 0xa59   :  { %v1740_v51 = vadd.f32 %v3547_v48, %v1739_v44  ;;  %v1783_v36 = vadd.f32 %v3547_v48, %v1782_v45  ;;  %v3282_v52 = vpop.f32.mrb[49].mxu0  ;;  %v3288_v53 = vpop.f32.mrb[53].mxu1 }
 0xa5a   :  { %v1742_v23 = vpop.f32.mrb[50].mxu0  ;;  %v1785_v54 = vpop.f32.mrb[54].mxu1 }
 0xa5b   :  { %v3283_v55 = vpop.f32.mrb[51].mxu0  ;;  %v3289_v56 = vpop.f32.mrb[55].mxu1  ;;  %v1972_v59 = vsel %vm651_vm3, %v1783_v36, -inf  ;;  %v1969_v60 = vsel %vm651_vm3, %v1740_v51, -inf }
 0xa5c   :  { %1973 = vmax.xlane.f32.xlu1 %v1972_v59  ;;  %1970 = vmax.xlane.f32.xlu0 %v1969_v60 }
 0xa60   :  { %v1828_v47 = vpop.f32.mrb[52].mxu0  ;;  %v1871_v49 = vpop.f32.mrb[56].mxu1 }
 0xa61   :  { %v1829_v61 = vadd.f32 %v3792_v6, %v1828_v47  ;;  %v1872_v63 = vadd.f32 %v3792_v6, %v1871_v49  ;;  %v3294_v40 = vpop.f32.mrb[53].mxu0  ;;  %v3300_v39 = vpop.f32.mrb[57].mxu1 }
 0xa62   :  { %v1831_v0 = vpop.f32.mrb[54].mxu0  ;;  %v1874_v50 = vpop.f32.mrb[58].mxu1 }
 0xa63   :  { %v3295_v4 = vpop.f32.mrb[55].mxu0  ;;  %v3301_v5 = vpop.f32.mrb[59].mxu1  ;;  %v1978_v57 = vsel %vm651_vm3, %v1872_v63, -inf  ;;  %v1975_v7 = vsel %vm651_vm3, %v1829_v61, -inf }
 0xa64   :  { %1979 = vmax.xlane.f32.xlu1 %v1978_v57  ;;  %1976 = vmax.xlane.f32.xlu0 %v1975_v7 }
 0xa68   :  { %v1914_v58 = vpop.f32.mrb[56].mxu0  ;;  %v1957_v8 = vpop.f32.mrb[60].mxu1 }
 0xa69   :  { %v1915_v17 = vadd.f32 %v3548_v15, %v1914_v58  ;;  %v1958_v6 = vadd.f32 %v3548_v15, %v1957_v8  ;;  %v3306_v9 = vpop.f32.mrb[57].mxu0  ;;  %v3312_v12 = vpop.f32.mrb[61].mxu1  ;;  %v1598_v15 = vmul.f32 %v4016_v3, %v4046_v1 }
 0xa6a   :  { %v1917_v13 = vpop.f32.mrb[58].mxu0  ;;  %v1960_v14 = vpop.f32.mrb[62].mxu1 }
 0xa6b   :  { %v3307_v18 = vpop.f32.mrb[59].mxu0  ;;  %v3313_v19 = vpop.f32.mrb[63].mxu1  ;;  %v1984_v20 = vsel %vm651_vm3, %v1958_v6, -inf  ;;  %v1981_v21 = vsel %vm651_vm3, %v1915_v17, -inf  ;;  %v1606_v14 = vpack.c.bf16 %v1598_v15, %v1598_v15 }
 0xa6c   :  { %1985 = vmax.xlane.f32.xlu1 %v1984_v20  ;;  %1982 = vmax.xlane.f32.xlu0 %v1981_v21 }
 0xae1   :  { %v1968_v22 = vpop.xlane.xlu1 %1967  ;;  %v1965_v26 = vpop.xlane.xlu0 %1964 }
 0xae2   :  { %v1988_v27 = vsub.f32 %v1697_v30, %v1968_v22  ;;  %v1987_v24 = vsub.f32 %v1654_v29, %v1965_v26  ;;  %v2201_v22 = vsel %vm751_vm2, %v1606_v14, 0 }
 0xae4   :  { %v1997_v25 = vmul.f32 1.442695, %v1988_v27  ;;  %v1995_v28 = vmul.f32 1.442695, %v1987_v24  ;;  %v1600_v27 = vmul.f32 %v4037_v16, %v4003_v62 }
 0xae6   :  { %3497 = vpow2.f32 %v1997_v25  ;;  %v1599_v25 = vmul.f32 %v4031_v11, %v4003_v62 }
 0xae7   :  { %3499 = vpow2.f32 %v1995_v28 }
 0xae9   :  { %v1974_v31 = vpop.xlane.xlu1 %1973  ;;  %v1971_v32 = vpop.xlane.xlu0 %1970 }
 0xaea   :  { %v1990_v33 = vsub.f32 %v1783_v36, %v1974_v31  ;;  %v1989_v37 = vsub.f32 %v1740_v51, %v1971_v32  ;;  %v1608_v32 = vpack.c.bf16 %v1600_v27, %v1600_v27 }
 0xaec   :  { %v2001_v38 = vmul.f32 1.442695, %v1990_v33  ;;  %v1999_v42 = vmul.f32 1.442695, %v1989_v37  ;;  %v1607_v37 = vpack.c.bf16 %v1599_v25, %v1599_v25 }
 0xaee   :  { %3501 = vpow2.f32 %v2001_v38 }
 0xaef   :  { %3503 = vpow2.f32 %v1999_v42  ;;  %v2293_v42 = vsel %vm751_vm2, %v1608_v32, 0 }
 0xaf0   :  { %v3498_v43 = vpop.eup %3497 }
 0xaf1   :  { %v3500_v41 = vpop.eup %3499  ;;  %v1980_v44 = vpop.xlane.xlu1 %1979  ;;  %v2014_v48 = vsel %vm651_vm3, %v3498_v43, 0.0 }
 0xaf2   :  { %v1977_v45 = vpop.xlane.xlu0 %1976  ;;  %v1992_v30 = vsub.f32 %v1872_v63, %v1980_v44  ;;  %2015 = vadd.xlane.f32.xlu1 %v2014_v48  ;;  %v2011_v52 = vsel %vm651_vm3, %v3500_v41, 0.0  ;;  %v2247_v44 = vsel %vm751_vm2, %v1607_v37, 0  ;;  %v1601_v48 = vmul.f32 %v4010_v2, %v4003_v62 }
 0xaf3   :  { %v1991_v29 = vsub.f32 %v1829_v61, %v1977_v45  ;;  %2012 = vadd.xlane.f32.xlu0 %v2011_v52 }
 0xaf4   :  { %v2005_v53 = vmul.f32 1.442695, %v1992_v30 }
 0xaf5   :  { %v2003_v23 = vmul.f32 1.442695, %v1991_v29 }
 0xaf6   :  { %3505 = vpow2.f32 %v2005_v53 }
 0xaf7   :  { %3507 = vpow2.f32 %v2003_v23 }
 0xaf8   :  { %v3502_v51 = vpop.eup %3501 }
 0xaf9   :  { %v4092_v36 = vpop.eup %3503  ;;  %v1986_v54 = vpop.xlane.xlu1 %1985  ;;  %v2020_v56 = vsel %vm651_vm3, %v3502_v51, 0.0 }
 0xafa   :  { %v1983_v55 = vpop.xlane.xlu0 %1982  ;;  %v1994_v59 = vsub.f32 %v1958_v6, %v1986_v54  ;;  %2021 = vadd.xlane.f32.xlu1 %v2020_v56  ;;  %v2017_v47 = vsel %vm651_vm3, %v4092_v36, 0.0  ;;  %v1597_v6 = vmul.f32 %v4010_v2, %v4046_v1 }
 0xafb   :  { %v1993_v60 = vsub.f32 %v1915_v17, %v1983_v55  ;;  %2018 = vadd.xlane.f32.xlu0 %v2017_v47 }
 0xafc   :  { %v2009_v49 = vmul.f32 1.442695, %v1994_v59  ;;  %v1605_v19 = vpack.c.bf16 %v1597_v6, %v1597_v6 }
 0xafd   :  { %v2007_v61 = vmul.f32 1.442695, %v1993_v60 }
 0xafe   :  { %3509 = vpow2.f32 %v2009_v49  ;;  %v2155_v1 = vsel %vm751_vm2, %v1605_v19, 0  ;;  %v3437_v49 = vld [vmem:[%s4285_s4 + $0x10] sm:$0xff]  }
 0xaff   :  { %3511 = vpow2.f32 %v2007_v61  ;;  %v3438_v61 = vld [vmem:[%s4285_s4 + $0x18] sm:$0xff]  }
 0xb00   :  { %v4097_v63 = vpop.eup %3505 }
 0xb01   :  { %v4099_v40 = vpop.eup %3507  ;;  %v2026_v39 = vsel %vm651_vm3, %v4097_v63, 0.0 }
 0xb02   :  { %2027 = vadd.xlane.f32.xlu1 %v2026_v39  ;;  %v2023_v0 = vsel %vm651_vm3, %v4099_v40, 0.0 }
 0xb03   :  { %2024 = vadd.xlane.f32.xlu0 %v2023_v0 }
 0xb08   :  { %v4105_v50 = vpop.eup %3509 }
 0xb09   :  { %v4107_v4 = vpop.eup %3511  ;;  %v2032_v5 = vsel %vm651_vm3, %v4105_v50, 0.0 }
 0xb0a   :  { %2033 = vadd.xlane.f32.xlu1 %v2032_v5  ;;  %v2029_v57 = vsel %vm651_vm3, %v4107_v4, 0.0 }
 0xb0b   :  { %2030 = vadd.xlane.f32.xlu0 %v2029_v57 }
 0xb7f   :  { %v2016_v7 = vpop.xlane.xlu1 %2015 }
 0xb80   :  { %3513 = vrcp.f32 %v2016_v7  ;;  %v2013_v58 = vpop.xlane.xlu0 %2012 }
 0xb81   :  { %3515 = vrcp.f32 %v2013_v58 }
 0xb87   :  { %v2022_v8 = vpop.xlane.xlu1 %2021 }
 0xb88   :  { %3517 = vrcp.f32 %v2022_v8  ;;  %v2019_v17 = vpop.xlane.xlu0 %2018 }
 0xb89   :  { %3519 = vrcp.f32 %v2019_v17 }
 0xb8a   :  { %v3514_v9 = vpop.eup %3513 }
 0xb8b   :  { %v3516_v12 = vpop.eup %3515  ;;  %v2044_v13 = vmul.f32 %v3514_v9, %v3498_v43 }
 0xb8c   :  { %v2043_v18 = vmul.f32 %v3516_v12, %v3500_v41  ;;  %v1602_v41 = vmul.f32 %v4016_v3, %v4003_v62  ;;  %v1609_v62 = vpack.c.bf16 %v1601_v48, %v1601_v48 }
 0xb8d   :  { %v2052_v20 = vpack.c.bf16 %v2044_v13, %v2044_v13 }
 0xb8e   :  { %v2051_v21 = vpack.c.bf16 %v2043_v18, %v2043_v18  ;;  %v1610_v52 = vpack.c.bf16 %v1602_v41, %v1602_v41 }
 0xb8f   :  { %3323 = vmatmul.mubr.msk.bf16.vlgmr.msra.gmra.mrb[64].mxu1 %vm651_vm3, %v2052_v20  ;;  %v2028_v26 = vpop.xlane.xlu1 %2027 }
 0xb90   :  { %3333 = vmatpush3.bf16.msra.mxu1 %v2201_v22  ;;  %3521 = vrcp.f32 %v2028_v26  ;;  %3317 = vmatmul.mubr.msk.bf16.vlgmr.msra.gmra.mrb[60].mxu0 %vm651_vm3, %v2051_v21  ;;  %v2025_v24 = vpop.xlane.xlu0 %2024 }
 0xb91   :  { %3327 = vmatpush3.bf16.msra.mxu0 %v2155_v1  ;;  %3523 = vrcp.f32 %v2025_v24  ;;  %3328 = vmatprep.mubr.msk.bf16.mxu0 %vm3575_vm1, %v3573_v10 }
 0xb92   :  { %v3518_v28 = vpop.eup %3517  ;;  %3334 = vmatprep.mubr.msk.bf16.mxu1 %vm3575_vm1, %v3573_v10  ;;  %3338 = vmatprep.subr.bf16.mxu0 %v3573_v10 }
 0xb93   :  { %v3520_v16 = vpop.eup %3519  ;;  %v2046_v31 = vmul.f32 %v3518_v28, %v3502_v51  ;;  %3344 = vmatprep.subr.bf16.mxu1 %v3573_v10  ;;  %v2385_v51 = vsel %vm751_vm2, %v1610_v52, 0 }
 0xb94   :  { %v2045_v33 = vmul.f32 %v3520_v16, %v4092_v36  ;;  %v2339_v36 = vsel %vm751_vm2, %v1609_v62, 0  ;;  %v2441_v62 = vld [vmem:[%s4290_s9 + $0x1b] ss:$0 sm:$0xff] }
 0xb95   :  { %v2054_v11 = vpack.c.bf16 %v2046_v31, %v2046_v31 }
 0xb96   :  { %v2053_v38 = vpack.c.bf16 %v2045_v33, %v2045_v33 }
 0xb97   :  { %3335 = vmatmul.mubr.msk.bf16.vlgmr.msra.gmra.mrb[68].mxu1 %vm651_vm3, %v2054_v11  ;;  %v2034_v43 = vpop.xlane.xlu1 %2033 }
 0xb98   :  { %3345 = vmatpush3.bf16.msra.mxu1 %v2293_v42  ;;  %3525 = vrcp.f32 %v2034_v43  ;;  %3329 = vmatmul.mubr.msk.bf16.vlgmr.msra.gmra.mrb[64].mxu0 %vm651_vm3, %v2053_v38  ;;  %v2031_v45 = vpop.xlane.xlu0 %2030 }
 0xb99   :  { %3339 = vmatpush3.bf16.msra.mxu0 %v2247_v44  ;;  %3527 = vrcp.f32 %v2031_v45  ;;  %3340 = vmatprep.mubr.msk.bf16.mxu0 %vm3575_vm1, %v3573_v10 }
 0xb9a   :  { %v3522_v30 = vpop.eup %3521  ;;  %3346 = vmatprep.mubr.msk.bf16.mxu1 %vm3575_vm1, %v3573_v10  ;;  %3350 = vmatprep.subr.bf16.mxu0 %v3573_v10 }
 0xb9b   :  { %v3524_v3 = vpop.eup %3523  ;;  %v2048_v29 = vmul.f32 %v3522_v30, %v4097_v63  ;;  %3356 = vmatprep.subr.bf16.mxu1 %v3573_v10 }
 0xb9c   :  { %v2047_v53 = vmul.f32 %v3524_v3, %v4099_v40 }
 0xb9d   :  { %v2056_v2 = vpack.c.bf16 %v2048_v29, %v2048_v29 }
 0xb9e   :  { %v2055_v23 = vpack.c.bf16 %v2047_v53, %v2047_v53 }
 0xb9f   :  { %3347 = vmatmul.mubr.msk.bf16.vlgmr.msra.gmra.mrb[72].mxu1 %vm651_vm3, %v2056_v2 }
 0xba0   :  { %3341 = vmatmul.mubr.msk.bf16.vlgmr.msra.gmra.mrb[68].mxu0 %vm651_vm3, %v2055_v23  ;;  %3357 = vmatpush3.bf16.msra.mxu1 %v2385_v51 }
 0xba1   :  { %3351 = vmatpush3.bf16.msra.mxu0 %v2339_v36  ;;  %3352 = vmatprep.mubr.msk.bf16.mxu0 %vm3575_vm1, %v3573_v10 }
 0xba2   :  { %v3526_v54 = vpop.eup %3525  ;;  %3358 = vmatprep.mubr.msk.bf16.mxu1 %vm3575_vm1, %v3573_v10  ;;  %3362 = vmatprep.subr.bf16.mxu0 %v3573_v10 }
 0xba3   :  { %v3528_v55 = vpop.eup %3527  ;;  %v2050_v56 = vmul.f32 %v3526_v54, %v4105_v50  ;;  %3370 = vmatprep.subr.bf16.mxu1 %v3573_v10 }
 0xba4   :  { %v2049_v59 = vmul.f32 %v3528_v55, %v4107_v4 }
 0xba5   :  { %v2058_v60 = vpack.c.bf16 %v2050_v56, %v2050_v56 }
 0xba6   :  { %v2057_v47 = vpack.c.bf16 %v2049_v59, %v2049_v59 }
 0xba7   :  { %3359 = vmatmul.mubr.msk.bf16.vlgmr.msra.gmra.mrb[76].mxu1 %vm651_vm3, %v2058_v60 }
 0xba8   :  { %3353 = vmatmul.mubr.msk.bf16.vlgmr.msra.gmra.mrb[72].mxu0 %vm651_vm3, %v2057_v47  ;;  %3374 = vmatprep.mubr.msk.bf16.mxu1 %vm3575_vm1, %v3573_v10 }
 0xba9   :  { %3366 = vmatprep.mubr.msk.bf16.mxu0 %vm3575_vm1, %v3573_v10  ;;  %3363 = vmatpush3.bf16.msra.mxu0 %v3437_v49 }
 0xbaa   :  { %3364 = vmatprep.subr.bf16.mxu0 %v3573_v10 }
 0xbad   :  { %3365 = vmatpush3.bf16.msra.mxu0 %v3438_v61 }
 0xbae   :  { %3378 = vmatprep.subr.bf16.mxu0 %v3573_v10 }
 0xc62   :  { %v2145_v63 = vpop.f32.mrb[64].mxu1 }
 0xc63   :  { %v2099_v40 = vpop.f32.mrb[60].mxu0  ;;  %v2428_v39 = vsel %vm41_vm0, %v2145_v63, 0.0  ;;  %v3324_v0 = vpop.f32.mrb[65].mxu1 }
 0xc64   :  { %v2427_v50 = vsel %vm41_vm0, %v2099_v40, 0.0  ;;  %v3318_v4 = vpop.f32.mrb[61].mxu0  ;;  %v2148_v5 = vpop.f32.mrb[66].mxu1 }
 0xc65   :  { %v2429_v57 = vadd.f32 %v2428_v39, %v2427_v50  ;;  %v2102_v7 = vpop.f32.mrb[62].mxu0  ;;  %v3325_v58 = vpop.f32.mrb[67].mxu1 }
 0xc66   :  { %v3319_v8 = vpop.f32.mrb[63].mxu0 }
 0xc6a   :  { %v2237_v15 = vpop.f32.mrb[68].mxu1 }
 0xc6b   :  { %v2191_v17 = vpop.f32.mrb[64].mxu0  ;;  %v3336_v6 = vpop.f32.mrb[69].mxu1  ;;  %v2432_v20 = vsel %vm41_vm0, %v2237_v15, 0.0 }
 0xc6c   :  { %v2430_v9 = vsel %vm41_vm0, %v2191_v17, 0.0  ;;  %v3330_v12 = vpop.f32.mrb[65].mxu0  ;;  %v2240_v13 = vpop.f32.mrb[70].mxu1 }
 0xc6d   :  { %v2431_v14 = vadd.f32 %v2430_v9, %v2429_v57  ;;  %v2194_v18 = vpop.f32.mrb[66].mxu0  ;;  %v3337_v19 = vpop.f32.mrb[71].mxu1 }
 0xc6e   :  { %v3331_v21 = vpop.f32.mrb[67].mxu0 }
 0xc6f   :  { %v2433_v22 = vadd.f32 %v2432_v20, %v2431_v14  ;;  %v2504_v20 = vld [vmem:[%s4290_s9 + $0x1c] ss:$0 sm:$0xff] }
 0xc72   :  { %v2329_v26 = vpop.f32.mrb[72].mxu1 }
 0xc73   :  { %v2283_v27 = vpop.f32.mrb[68].mxu0  ;;  %v2435_v1 = vsel %vm41_vm0, %v2329_v26, 0.0  ;;  %v3348_v24 = vpop.f32.mrb[73].mxu1 }
 0xc74   :  { %v2434_v25 = vsel %vm41_vm0, %v2283_v27, 0.0  ;;  %v3342_v28 = vpop.f32.mrb[69].mxu0  ;;  %v2332_v16 = vpop.f32.mrb[74].mxu1  ;;  %v2505_v24 = vld [vmem:[%s4290_s9 + $0x1d] ss:$0 sm:$0xff] }
 0xc75   :  { %v2436_v31 = vadd.f32 %v2435_v1, %v2434_v25  ;;  %v2286_v32 = vpop.f32.mrb[70].mxu0  ;;  %v3349_v33 = vpop.f32.mrb[75].mxu1 }
 0xc76   :  { %v3343_v37 = vpop.f32.mrb[71].mxu0  ;;  %v3441_v32 = vld [vmem:[%s4287_s6 + $0x20] sm:$0xff]   ;;  %v3442_v33 = vld [vmem:[%s4287_s6 + $0x28] sm:$0xff]  }
 0xc77   :  { %v3443_v37 = vld [vmem:[%s4287_s6 + $0x30] sm:$0xff]  }
 0xc7a   :  { %v2421_v11 = vpop.f32.mrb[76].mxu1 }
 0xc7b   :  { %v2375_v38 = vpop.f32.mrb[72].mxu0  ;;  %v3360_v42 = vpop.f32.mrb[77].mxu1  ;;  %v2439_v3 = vsel %vm41_vm0, %v2421_v11, 0.0  ;;  %v3444_v11 = vld [vmem:[%s4287_s6 + $0x38] sm:$0xff]  }
 0xc7c   :  { %v2437_v43 = vsel %vm41_vm0, %v2375_v38, 0.0  ;;  %v3354_v41 = vpop.f32.mrb[73].mxu0  ;;  %v2424_v44 = vpop.f32.mrb[78].mxu1  ;;  %v2544_v38 = vld [vmem:[%s4290_s9 + $0x1e] ss:$0 sm:$0xff] }
 0xc7d   :  { %v2438_v45 = vadd.f32 %v2437_v43, %v2436_v31  ;;  %v2378_v48 = vpop.f32.mrb[74].mxu0  ;;  %v3361_v30 = vpop.f32.mrb[79].mxu1 }
 0xc7e   :  { %v3355_v29 = vpop.f32.mrb[75].mxu0 }
 0xc7f   :  { %v2440_v52 = vadd.f32 %v2439_v3, %v2438_v45 }
 0xc81   :  { %v2442_v53 = vpack.c.bf16 %v2440_v52, %v2433_v22 }
 0xc83   :  { %3367 = vmatmul.mubr.msk.bf16.vlgmr.msra.gmra.mrb[76].mxu0 %vm41_vm0, %v2442_v53 }
 0xc84   :  { %3386 = vmatprep.mubr.msk.bf16.mxu0 %vm3575_vm1, %v3573_v10  ;;  %3379 = vmatpush3.bf16.msra.mxu0 %v3441_v32 }
 0xc85   :  { %3380 = vmatprep.subr.bf16.mxu0 %v3573_v10 }
 0xc88   :  { %3381 = vmatpush3.bf16.msra.mxu0 %v3442_v33 }
 0xc89   :  { %3382 = vmatprep.subr.bf16.mxu0 %v3573_v10 }
 0xc8c   :  { %3383 = vmatpush3.bf16.msra.mxu0 %v3443_v37 }
 0xc8d   :  { %3384 = vmatprep.subr.bf16.mxu0 %v3573_v10 }
 0xc90   :  { %3385 = vmatpush3.bf16.msra.mxu0 %v3444_v11  ;;  %v2704_v11 = vld [vmem:[%s4290_s9 + $0x30] ss:$0 sm:$0xff] }
 0xd56   :  { %v2497_v2 = vpop.f32.mrb[76].mxu0 }
 0xd57   :  { %v2498_v23 = vadd.f32 %v2497_v2, %v2441_v62  ;;  %v3368_v51 = vpop.f32.mrb[77].mxu0 }
 0xd58   :  { %v2500_v36 = vpop.f32.mrb[78].mxu0 }
 0xd59   :  { %v2506_v54 = vadd.f32 %v2498_v23, %v3969_v34  ;;  %v2501_v55 = vadd.f32 %v2500_v36, %v2441_v62  ;;  %v3369_v56 = vpop.f32.mrb[79].mxu0  ;;  %v3439_v34 = vld [vmem:[%s4286_s5 + $0x10] sm:$0xff]  }
 0xd5a   :  { %3371 = vmatpush3.bf16.msra.mxu1 %v3439_v34 }
 0xd5b   :  { %v2507_v59 = vadd.f32 %v2501_v55, %v3971_v35  ;;  %v2508_v60 = vsel %vm41_vm0, %v2506_v54, 0.0  ;;  %v2516_v47 = vmul.f32 %v2506_v54, %v2506_v54  ;;  %v3440_v35 = vld [vmem:[%s4286_s5 + $0x18] sm:$0xff]   ;;  %3372 = vmatprep.subr.bf16.mxu1 %v3573_v10 }
 0xd5c   :  { %2509 = vadd.xlane.f32.xlu0 %v2508_v60 }
 0xd5d   :  { %v2511_v49 = vsel %vm41_vm0, %v2507_v59, 0.0  ;;  %v2517_v61 = vmul.f32 %v2507_v59, %v2507_v59  ;;  %v2518_v63 = vsel %vm41_vm0, %v2516_v47, 0.0 }
 0xd5e   :  { %2512 = vadd.xlane.f32.xlu1 %v2511_v49  ;;  %3373 = vmatpush3.bf16.msra.mxu1 %v3440_v35 }
 0xd5f   :  { %v2521_v40 = vsel %vm41_vm0, %v2517_v61, 0.0  ;;  %3390 = vmatprep.subr.bf16.mxu1 %v3573_v10 }
 0xd60   :  { %2519 = vadd.xlane.f32.xlu0 %v2518_v63 }
 0xd62   :  { %2522 = vadd.xlane.f32.xlu1 %v2521_v40  ;;  %v2625_v40 = vld [vmem:[%s4290_s9 + $0x1f] ss:$0 sm:$0xff] }
 0xde9   :  { %v2510_v39 = vpop.xlane.xlu0 %2509 }
 0xdea   :  { %v2514_v0 = vmul.f32 0.03125, %v2510_v39 }
 0xdeb   :  { %v2513_v50 = vpop.xlane.xlu1 %2512 }
 0xdec   :  { %v2515_v4 = vmul.f32 0.03125, %v2513_v50  ;;  %v2526_v57 = vmul.f32 %v2514_v0, %v2514_v0  ;;  %v2532_v18 = vsub.f32 %v2506_v54, %v2514_v0 }
 0xded   :  { %v2520_v5 = vpop.xlane.xlu0 %2519 }
 0xdee   :  { %v2524_v7 = vmul.f32 0.03125, %v2520_v5  ;;  %v2527_v8 = vmul.f32 %v2515_v4, %v2515_v4  ;;  %v2533_v21 = vsub.f32 %v2507_v59, %v2515_v4 }
 0xdef   :  { %v2523_v58 = vpop.xlane.xlu1 %2522 }
 0xdf0   :  { %v2528_v15 = vsub.f32 %v2524_v7, %v2526_v57  ;;  %v2525_v17 = vmul.f32 0.03125, %v2523_v58 }
 0xdf2   :  { %v2530_v6 = vmax.f32 %v2528_v15, 0.0  ;;  %v2529_v9 = vsub.f32 %v2525_v17, %v2527_v8 }
 0xdf4   :  { %v2534_v12 = vadd.f32 1e-12, %v2530_v6  ;;  %v2531_v13 = vmax.f32 %v2529_v9, 0.0  ;;  %v3445_v9 = vld [vmem:[%s4288_s7] sm:$0xff]  }
 0xdf6   :  { %3529 = vrsqrt.f32 %v2534_v12  ;;  %v2535_v14 = vadd.f32 1e-12, %v2531_v13  ;;  %v3446_v12 = vld [vmem:[%s4288_s7 + $0x8] sm:$0xff]  }
 0xdf8   :  { %3531 = vrsqrt.f32 %v2535_v14 }
 0xe00   :  { %v3530_v19 = vpop.eup %3529 }
 0xe01   :  { %v2538_v22 = vmul.f32 %v3530_v19, %v2532_v18 }
 0xe02   :  { %v3532_v26 = vpop.eup %3531 }
 0xe03   :  { %v2539_v27 = vmul.f32 %v3532_v26, %v2533_v21  ;;  %v2540_v1 = vmul.f32 %v2538_v22, %v2504_v20 }
 0xe05   :  { %v2541_v25 = vmul.f32 %v2539_v27, %v2504_v20  ;;  %v2542_v28 = vadd.f32 %v2540_v1, %v2505_v24 }
 0xe07   :  { %v2543_v16 = vadd.f32 %v2541_v25, %v2505_v24 }
 0xe09   :  { %v2545_v31 = vpack.c.bf16 %v2543_v16, %v2542_v28 }
 0xe0b   :  { %3375 = vmatmul.mubr.msk.bf16.vlgmr.msra.gmra.mrb[80].mxu1 %vm41_vm0, %v2545_v31 }
 0xe0c   :  { %3394 = vmatprep.mubr.msk.bf16.mxu1 %vm3575_vm1, %v3573_v10  ;;  %3391 = vmatpush3.bf16.msra.mxu1 %v3445_v9 }
 0xe0d   :  { %3392 = vmatprep.subr.bf16.mxu1 %v3573_v10 }
 0xe10   :  { %3393 = vmatpush3.bf16.msra.mxu1 %v3446_v12 }
 0xe11   :  { %3398 = vmatprep.subr.bf16.mxu1 %v3573_v10 }
 0xede   :  { %v2600_v42 = vpop.f32.mrb[80].mxu1 }
 0xedf   :  { %v2601_v43 = vadd.f32 %v2600_v42, %v2544_v38  ;;  %v3376_v41 = vpop.f32.mrb[81].mxu1 }
 0xee0   :  { %v2603_v44 = vpop.f32.mrb[82].mxu1  ;;  %v2705_v41 = vld [vmem:[%s4290_s9 + $0x31] ss:$0 sm:$0xff] }
 0xee1   :  { %v2609_v45 = vmul.f32 0.044715, %v2601_v43  ;;  %v2604_v48 = vadd.f32 %v2603_v44, %v2544_v38  ;;  %v3377_v30 = vpop.f32.mrb[83].mxu1  ;;  %v2607_v59 = vmul.f32 0.5, %v2601_v43 }
 0xee3   :  { %v2611_v3 = vmul.f32 %v2609_v45, %v2601_v43  ;;  %v2610_v29 = vmul.f32 0.044715, %v2604_v48  ;;  %v2608_v60 = vmul.f32 0.5, %v2604_v48 }
 0xee5   :  { %v2613_v52 = vmul.f32 %v2611_v3, %v2601_v43  ;;  %v2612_v53 = vmul.f32 %v2610_v29, %v2604_v48 }
 0xee7   :  { %v2615_v62 = vadd.f32 %v2613_v52, %v2601_v43  ;;  %v2614_v2 = vmul.f32 %v2612_v53, %v2604_v48 }
 0xee9   :  { %v2617_v23 = vmul.f32 0.7978846, %v2615_v62  ;;  %v2616_v51 = vadd.f32 %v2614_v2, %v2604_v48 }
 0xeeb   :  { %3533 = vtanh.f32 %v2617_v23  ;;  %v2618_v36 = vmul.f32 0.7978846, %v2616_v51 }
 0xeed   :  { %3535 = vtanh.f32 %v2618_v36  ;;  %v3447_v36 = vld [vmem:[%s4289_s8] sm:$0xff]  }
 0xef5   :  { %v3534_v54 = vpop.eup %3533 }
 0xef6   :  { %v2621_v55 = vadd.f32 1.0, %v3534_v54  ;;  %v3448_v54 = vld [vmem:[%s4289_s8 + $0x8] sm:$0xff]  }
 0xef7   :  { %v3536_v56 = vpop.eup %3535 }
 0xef8   :  { %v2622_v47 = vadd.f32 1.0, %v3536_v56  ;;  %v2623_v49 = vmul.f32 %v2621_v55, %v2607_v59  ;;  %v2744_v55 = vld [vmem:[%s4290_s9 + $0x32] ss:$0 sm:$0xff] }
 0xefa   :  { %v2624_v61 = vmul.f32 %v2622_v47, %v2608_v60 }
 0xefc   :  { %v2626_v63 = vpack.c.bf16 %v2624_v61, %v2623_v49 }
 0xefe   :  { %3387 = vmatmul.mubr.msk.bf16.vlgmr.msra.gmra.mrb[80].mxu0 %vm1347_vm4, %v2626_v63 }
 0xfd1   :  { %v2697_v34 = vpop.f32.mrb[80].mxu0 }
 0xfd2   :  { %v2698_v35 = vadd.f32 %v2697_v34, %v2625_v40  ;;  %v3388_v39 = vpop.f32.mrb[81].mxu0 }
 0xfd3   :  { %v2700_v0 = vpop.f32.mrb[82].mxu0 }
 0xfd4   :  { %v2706_v50 = vadd.f32 %v2698_v35, %v2542_v28  ;;  %v2701_v4 = vadd.f32 %v2700_v0, %v2625_v40  ;;  %v3389_v5 = vpop.f32.mrb[83].mxu0  ;;  %v3576_v40 = vmov 1966171168  }
 0xfd5   :  { %v2878_v34 = vunpack.c.l.s4 %v3576_v40 }
 0xfd6   :  { %v2707_v57 = vadd.f32 %v2701_v4, %v2543_v16  ;;  %v2708_v7 = vsel %vm41_vm0, %v2706_v50, 0.0  ;;  %v2716_v58 = vmul.f32 %v2706_v50, %v2706_v50 }
 0xfd7   :  { %2709 = vadd.xlane.f32.xlu1 %v2708_v7  ;;  %v2879_v35 = vunpack.c.0.s8 %v2878_v34 }
 0xfd8   :  { %v2711_v8 = vsel %vm41_vm0, %v2707_v57, 0.0  ;;  %v2717_v15 = vmul.f32 %v2707_v57, %v2707_v57  ;;  %v2718_v17 = vsel %vm41_vm0, %v2716_v58, 0.0 }
 0xfd9   :  { %2712 = vadd.xlane.f32.xlu0 %v2711_v8  ;;  %v2882_v39 = vsub.s32 %v2879_v35, %v3688_v46 }
 0xfda   :  { %v2721_v6 = vsel %vm41_vm0, %v2717_v15, 0.0 }
 0xfdb   :  { %2719 = vadd.xlane.f32.xlu1 %v2718_v17 }
 0xfdd   :  { %2722 = vadd.xlane.f32.xlu0 %v2721_v6 }
0x1064   :  { %v2710_v13 = vpop.xlane.xlu1 %2709 }
0x1065   :  { %v2714_v14 = vmul.f32 0.03125, %v2710_v13 }
0x1066   :  { %v2713_v18 = vpop.xlane.xlu0 %2712 }
0x1067   :  { %v2715_v19 = vmul.f32 0.03125, %v2713_v18  ;;  %v2726_v21 = vmul.f32 %v2714_v14, %v2714_v14  ;;  %v2732_v33 = vsub.f32 %v2706_v50, %v2714_v14 }
0x1068   :  { %v2720_v20 = vpop.xlane.xlu1 %2719 }
0x1069   :  { %v2724_v22 = vmul.f32 0.03125, %v2720_v20  ;;  %v2727_v27 = vmul.f32 %v2715_v19, %v2715_v19  ;;  %v2733_v38 = vsub.f32 %v2707_v57, %v2715_v19 }
0x106a   :  { %v2723_v26 = vpop.xlane.xlu0 %2722 }
0x106b   :  { %v2728_v1 = vsub.f32 %v2724_v22, %v2726_v21  ;;  %v2725_v24 = vmul.f32 0.03125, %v2723_v26 }
0x106d   :  { %v2730_v25 = vmax.f32 %v2728_v1, 0.0  ;;  %v2729_v28 = vsub.f32 %v2725_v24, %v2727_v27 }
0x106f   :  { %v2734_v16 = vadd.f32 1e-12, %v2730_v25  ;;  %v2731_v31 = vmax.f32 %v2729_v28, 0.0 }
0x1071   :  { %3537 = vrsqrt.f32 %v2734_v16  ;;  %v2735_v32 = vadd.f32 1e-12, %v2731_v31 }
0x1073   :  { %3539 = vrsqrt.f32 %v2735_v32 }
0x107b   :  { %v3538_v37 = vpop.eup %3537 }
0x107c   :  { %v2738_v42 = vmul.f32 %v3538_v37, %v2732_v33 }
0x107d   :  { %v3540_v43 = vpop.eup %3539 }
0x107e   :  { %v2740_v44 = vmul.f32 %v2738_v42, %v2704_v11  ;;  %v2739_v45 = vmul.f32 %v3540_v43, %v2733_v38 }
0x1080   :  { %v2741_v48 = vmul.f32 %v2739_v45, %v2704_v11  ;;  %v2742_v30 = vadd.f32 %v2740_v44, %v2705_v41 }
0x1082   :  { %v2743_v3 = vadd.f32 %v2741_v48, %v2705_v41  ;;  %v2745_v29 = vpack.c.bf16 %v2742_v30, %v2742_v30 }
0x1084   :  { %v2746_v52 = vpack.c.bf16 %v2743_v3, %v2743_v3  ;;  %v2753_v62 = vunpack.c.l.b16 %v2745_v29 }
0x1086   :  { %v2754_v53 = vunpack.c.l.b16 %v2746_v52 }
0x1088   :  { %v2755_v2 = vrot.slane %v2754_v53, 7 }
0x108a   :  { %v2757_v23 = vsel %vm2756_vm5, %v2755_v2, %v2753_v62 }
0x108b   :  { %v2758_v51 = vpack.c.b16 %v2757_v23, %v2757_v23 }
0x108d   :  { %3395 = vmatmul.mubr.msk.bf16.vlgmr.msra.gmra.mrb[84].mxu1 %vm41_vm0, %v2758_v51 }
0x108e   :  { %3402 = vmatprep.mubr.msk.bf16.mxu1 %vm3575_vm1, %v3573_v10  ;;  %3399 = vmatpush3.bf16.msra.mxu1 %v3447_v36 }
0x108f   :  { %3400 = vmatprep.subr.bf16.mxu1 %v3573_v10  ;;  %v2815_v10 = vld [vmem:[%s4290_s9 + $0x33] ss:$0 sm:$0xff] }
0x1092   :  { %3401 = vmatpush3.bf16.msra.mxu1 %v3448_v54 }
0x1160   :  { %v2808_v56 = vpop.f32.mrb[84].mxu1 }
0x1161   :  { %v2809_v59 = vadd.f32 %v2808_v56, %v2744_v55  ;;  %v3396_v60 = vpop.f32.mrb[85].mxu1 }
0x1162   :  { %v2811_v47 = vpop.f32.mrb[86].mxu1 }
0x1163   :  { %3541 = vtanh.f32 %v2809_v59  ;;  %v3397_v49 = vpop.f32.mrb[87].mxu1 }
0x116d   :  { %v3542_v61 = vpop.eup %3541 }
0x116e   :  { %v2816_v63 = vpack.c.bf16 %v3542_v61, %v3542_v61 }
0x1170   :  { %3403 = vmatmul.mubr.msk.bf16.vlgmr.msra.gmra.mrb[88].mxu1 %vm41_vm0, %v2816_v63 }
0x1243   :  { %v2870_v0 = vpop.f32.mrb[88].mxu1 }
0x1244   :  { %v2871_v50 = vadd.f32 %v2870_v0, %v2815_v10  ;;  %v3404_v4 = vpop.f32.mrb[89].mxu1 }
0x1245   :  { %v2873_v5 = vpop.f32.mrb[90].mxu1 }
0x1246   :  { %v2883_v57 = vrot.slane %v2871_v50, %v2882_v39  ;;  %v3405_v7 = vpop.f32.mrb[91].mxu1 }
0x1248   :  { %v2884_v58 = vcombine.high %v2883_v57, %v2883_v57  ;;  %v2891_v8 = vrot.slane %v2883_v57, %v2882_v39 }
0x124a   :  { %v2898_v15 = vrot.slane %v2884_v58, %v2882_v39  ;;  %2902 = vst.msk [vmem:[#allocation2] sm:$0x1] %vm2901_vm6, %v2891_v8 }
0x124c   :  { %2903 = vst.msk [vmem:[#allocation2 + $0x1] sm:$0x1] %vm2901_vm6, %v2898_v15 }
0x124d   :  { %3560 = shalt.err (!%p3557_p4)
}
0x124e   :  { %s3561_s29 = scalar_lea.hbm %s4291_s10, 32 }
0x124f   :  { %p3562_p5 = scmp.ne.s32.totalorder %s4291_s10, %s3561_s29  ;;  %p3565_p6 = scmp.lt.u32.totalorder %s3561_s29, %s4291_s10 }
0x1251   :  { %p3567_p7 = pnand %p3565_p6, %p3562_p5 }
0x1253   :  { %3570 = shalt.err (!%p3567_p7)
}
0x1254   :  { %s3578_s2 = smov 16   ;;  %s3579_s14 = smov 1  }
0x1255   :  { %2915 = dma.vmem_to_hbm [thread:$0]  %s2910_s3, 32, %s4291_s10, [#allocation3], %s3578_s2, %s3578_s2, %s3579_s14  }
0x1256   :  { %3571 = dma.done.wait [#allocation3], 32  }
0x1257   :  { %3572 = vsyncadd [#allocation3], 4294967264 }
0x1258   :  { %2919 = vsyncpa [#allocation3], 1 }

</bundles_post_ra>
